<compile_context>
chip_gen: v7x
topology: tpu7x:2x2x1
jax: 0.10.0
libtpu: 0.0.40
codegen_flags: <defaults>
</compile_context>

<pallas_src>
import jax
import jax.numpy as jnp
import numpy as np
from jax.experimental import pallas as pl
from jax.experimental.pallas import tpu as pltpu


# ----------------------------------------------------------------------------
# Kernel: per-row biased variance -> x * rsqrt(var + eps) * weight
# ----------------------------------------------------------------------------
def _biasfree_layernorm_kernel(x_ref, w_ref, o_ref):
    x = x_ref[...].astype(jnp.float32)          # (TR, C)
    w = w_ref[...].astype(jnp.float32)          # (1, C) -> broadcast over rows
    mean = jnp.mean(x, axis=-1, keepdims=True)  # (TR, 1)
    xc = x - mean
    var = jnp.mean(xc * xc, axis=-1, keepdims=True)   # unbiased=False
    inv = jax.lax.rsqrt(var + 1e-5)             # EUP slot
    o_ref[...] = (x * inv * w).astype(o_ref.dtype)


def biasfree_layernorm(x, weight, *, block_rows=512):
    """x: (..., C), weight: (C,). Returns same shape/dtype as x."""
    orig_shape = x.shape
    C = orig_shape[-1]
    assert weight.shape == (C,), (weight.shape, C)

    R = 1
    for d in orig_shape[:-1]:
        R *= d
    x2 = x.reshape(R, C)

    # Row tile: multiple of 8 (sublane), capped at block_rows.
    tr = min(block_rows, ((R + 7) // 8) * 8)
    tr = max(8, ((tr + 7) // 8) * 8)
    n_blocks = pl.cdiv(R, tr)
    Rp = n_blocks * tr
    if Rp != R:
        x2 = jnp.pad(x2, ((0, Rp - R), (0, 0)))

    w2 = weight.reshape(1, C)

    out = pl.pallas_call(
        _biasfree_layernorm_kernel,
        out_shape=jax.ShapeDtypeStruct((Rp, C), x.dtype),
        grid=(n_blocks,),
        in_specs=[
            pl.BlockSpec((tr, C), lambda i: (i, 0)),   # streamed row tiles
            pl.BlockSpec((1, C), lambda i: (0, 0)),    # weight stays resident
        ],
        out_specs=pl.BlockSpec((tr, C), lambda i: (i, 0)),
        compiler_params=pltpu.CompilerParams(
            dimension_semantics=("parallel",),
            vmem_limit_bytes=64 * 1024 * 1024,
        ),
    )(x2, w2)

    if Rp != R:
        out = out[:R]
    return out.reshape(orig_shape)


# ----------------------------------------------------------------------------
# Pure-JAX reference (mirrors the PyTorch semantics)
# ----------------------------------------------------------------------------
def reference_forward(x, weight):
    var = jnp.var(x.astype(jnp.float32), axis=-1, keepdims=True)  # ddof=0
    y = x.astype(jnp.float32) / jnp.sqrt(var + 1e-5) * weight.astype(jnp.float32)
    return y.astype(x.dtype)


if __name__ == "__main__":
    key = jax.random.PRNGKey(0)
    k0, k1, k2, k3 = jax.random.split(key, 4)

    # Main test: lane-dense case (C = 128), rows = batch * tokens.
    B, S, C = 2, 256, 128
    x = jax.random.normal(k0, (B, S, C), jnp.float32)
    w = 1.0 + 0.1 * jax.random.normal(k1, (C,), jnp.float32)

    y = jax.block_until_ready(biasfree_layernorm(x, w))
    assert y.shape == x.shape, y.shape
    y_ref = jax.block_until_ready(reference_forward(x, w))
    np.testing.assert_allclose(np.asarray(y), np.asarray(y_ref),
                               rtol=1e-5, atol=1e-5)

    # Secondary test: odd sizes (C not a multiple of 128, rows not a multiple
    # of the tile) to exercise the full-dim C block and the row-padding path.
    x2 = jax.random.normal(k2, (2, 4, 13, 48), jnp.float32)
    w2 = 1.0 + 0.1 * jax.random.normal(k3, (48,), jnp.float32)
    y2 = jax.block_until_ready(biasfree_layernorm(x2, w2, block_rows=64))
    y2_ref = jax.block_until_ready(reference_forward(x2, w2))
    np.testing.assert_allclose(np.asarray(y2), np.asarray(y2_ref),
                               rtol=1e-5, atol=1e-5)

    print("KERNEL_OK")
</pallas_src>

<mosaic_0001>
module attributes {stable_mosaic.version = 11 : i64} {
  func.func @_biasfree_layernorm_kernel(%arg0: i32, %arg1: memref<512x128xf32, #tpu.memory_space<vmem>>, %arg2: memref<1x128xf32, #tpu.memory_space<vmem>>, %arg3: memref<512x128xf32, #tpu.memory_space<vmem>>) attributes {dimension_semantics = [#tpu.dimension_semantics<parallel>], iteration_bounds = array<i64: 1>, scalar_prefetch = 0 : i64, scratch_operands = 0 : i64, tpu.core_type = #tpu.core_type<tc>, window_params = [{transform_indices = @transform_0, window_bounds = array<i64: 512, 128>}, {pipeline_mode = #tpu.pipeline_mode<synchronous>, transform_indices = @transform_1, window_bounds = array<i64: 1, 128>}, {transform_indices = @transform_2, window_bounds = array<i64: 512, 128>}]} {
    %c0 = arith.constant 0 : index
    %c0_0 = arith.constant 0 : index
    %0 = vector.load %arg1[%c0, %c0_0] : memref<512x128xf32, #tpu.memory_space<vmem>>, vector<512x128xf32>
    %c0_1 = arith.constant 0 : index
    %c0_2 = arith.constant 0 : index
    %1 = vector.load %arg2[%c0_1, %c0_2] : memref<1x128xf32, #tpu.memory_space<vmem>>, vector<1x128xf32>
    %cst = arith.constant dense<0.000000e+00> : vector<512xf32>
    %2 = vector.multi_reduction <add>, %0, %cst [1] : vector<512x128xf32> to vector<512xf32>
    %3 = vector.shape_cast %2 : vector<512xf32> to vector<512x1xf32>
    %cst_3 = arith.constant 1.280000e+02 : f32
    %4 = vector.broadcast %cst_3 : f32 to vector<512x1xf32>
    %5 = arith.divf %3, %4 : vector<512x1xf32>
    %6 = vector.broadcast %5 : vector<512x1xf32> to vector<512x128xf32>
    %7 = arith.subf %0, %6 : vector<512x128xf32>
    %8 = arith.mulf %7, %7 : vector<512x128xf32>
    %cst_4 = arith.constant dense<0.000000e+00> : vector<512xf32>
    %9 = vector.multi_reduction <add>, %8, %cst_4 [1] : vector<512x128xf32> to vector<512xf32>
    %10 = vector.shape_cast %9 : vector<512xf32> to vector<512x1xf32>
    %cst_5 = arith.constant 1.280000e+02 : f32
    %11 = vector.broadcast %cst_5 : f32 to vector<512x1xf32>
    %12 = arith.divf %10, %11 : vector<512x1xf32>
    %cst_6 = arith.constant 9.99999974E-6 : f32
    %13 = vector.broadcast %cst_6 : f32 to vector<512x1xf32>
    %14 = arith.addf %12, %13 : vector<512x1xf32>
    %15 = math.rsqrt %14 : vector<512x1xf32>
    %16 = vector.broadcast %15 : vector<512x1xf32> to vector<512x128xf32>
    %17 = arith.mulf %0, %16 : vector<512x128xf32>
    %18 = vector.broadcast %1 : vector<1x128xf32> to vector<512x128xf32>
    %19 = arith.mulf %17, %18 : vector<512x128xf32>
    %c0_7 = arith.constant 0 : index
    %c0_8 = arith.constant 0 : index
    %20 = vector.load %arg3[%c0_7, %c0_8] : memref<512x128xf32, #tpu.memory_space<vmem>>, vector<512x128xf32>
    tpu.vector_store %arg3[%c0_7, %c0_8], %19 {strides = array<i32>} : memref<512x128xf32, #tpu.memory_space<vmem>>, vector<512x128xf32>,
    return
  }
  func.func @transform_0(%arg0: i32) -> (i32, i32) {
    %c0_i32 = arith.constant 0 : i32
    %c0_i32_0 = arith.constant 0 : i32
    return %arg0, %c0_i32 : i32, i32
  }
  func.func @transform_1(%arg0: i32) -> (i32, i32) {
    %c0_i32 = arith.constant 0 : i32
    %c0_i32_0 = arith.constant 0 : i32
    %c0_i32_1 = arith.constant 0 : i32
    return %c0_i32, %c0_i32_0 : i32, i32
  }
  func.func @transform_2(%arg0: i32) -> (i32, i32) {
    %c0_i32 = arith.constant 0 : i32
    %c0_i32_0 = arith.constant 0 : i32
    return %arg0, %c0_i32 : i32, i32
  }
}

</mosaic_0001>

<bundles_post_ra>
// kernel: tpu_custom_call.1
= control target key start
LH: loop header
LB: loop body
LE: loop exit
PB: predicated region body
PF: predicated region fallthrough
CT: control target
= control target key end

     0   :  { %7 = vsyncpa [#allocation3], 0  ;;  %s1614_s0 = inlined_call_operand.hbm [shape: f32[512,128], index: 0, kind: input, shape index: {}]   ;;  %s1615_s1 = inlined_call_operand.hbm [shape: f32[1,128], index: 1, kind: input, shape index: {}]   ;;  %s1616_s2 = inlined_call_operand.hbm [shape: f32[512,128], index: 2, kind: output, shape index: {}]  }
   0x1   :  { %8 = vsyncpa [#allocation6], 0 }
   0x2   :  { %9 = vsyncpa [#allocation4], 0  ;;  %s1224_s9 = smov [#allocation2]   ;;  %s1152_s13 = scalar_lea.hbm %s1614_s0, 8192 }
   0x3   :  { %s15_s10 = sshll.u32 %s1224_s9, 4  ;;  %p1153_p0 = scmp.ne.s32.totalorder %s1614_s0, %s1152_s13  ;;  %s16_s10 = int_to_ptr.vmem [resolvable:$true] %s15_s10 }
   0x4   :  { %p1156_p1 = scmp.lt.u32.totalorder %s1152_s13, %s1614_s0 }
   0x6   :  { %p1158_p2 = pnand %p1156_p1, %p1153_p0 }
   0x8   :  { %1161 = shalt.err (!%p1158_p2)
}
   0x9   :  { %s1162_s18 = scalar_lea.vmem %s16_s10, 8192  ;;  %p1167_p4 = scmp.lt.s32.totalorder %s16_s10, %s16_s10 }
   0xa   :  { %p1163_p3 = scmp.ne.s32.totalorder %s16_s10, %s1162_s18  ;;  %p1168_p5 = scmp.lt.s32.totalorder %s1162_s18, %s1162_s18 }
   0xc   :  { %p1169_p6 = por %p1168_p5, %p1167_p4 }
   0xe   :  { %p1170_p7 = pnand %p1169_p6, %p1163_p3 }
  0x10   :  { %1173 = shalt.err (!%p1170_p7)
}
  0x11   :  { %s1225_s19 = smov 128   ;;  %s1226_s20 = smov 8  }
  0x12   :  { %21 = dma.hbm_to_vmem [thread:$0]  %s1614_s0, 8192, %s16_s10, [#allocation3], %s1225_s19, %s1225_s19, %s1226_s20  }
  0x13   :  { %s1227_s23 = smov [#allocation5]   ;;  %s1174_s27 = scalar_lea.hbm %s1615_s1, 16 }
  0x14   :  { %s28_s24 = sshll.u32 %s1227_s23, 4  ;;  %p1175_p8 = scmp.ne.s32.totalorder %s1615_s1, %s1174_s27  ;;  %s29_s24 = int_to_ptr.vmem [resolvable:$true] %s28_s24 }
  0x15   :  { %p1178_p9 = scmp.lt.u32.totalorder %s1174_s27, %s1615_s1 }
  0x17   :  { %p1180_p10 = pnand %p1178_p9, %p1175_p8 }
  0x19   :  { %1183 = shalt.err (!%p1180_p10)
}
  0x1a   :  { %s1184_s4 = scalar_lea.vmem %s29_s24, 16  ;;  %s1188_s0 = scalar_lea.vmem %s29_s24, 32 }
  0x1b   :  { %p1185_p11 = scmp.ne.s32.totalorder %s29_s24, %s1184_s4  ;;  %p1189_p12 = scmp.lt.s32.totalorder %s29_s24, %s29_s24 }
  0x1c   :  { %p1190_p13 = scmp.lt.s32.totalorder %s1188_s0, %s1184_s4 }
  0x1e   :  { %p1191_p0 = por %p1190_p13, %p1189_p12 }
  0x20   :  { %p1192_p1 = pnand %p1191_p0, %p1185_p11 }
  0x22   :  { %1195 = shalt.err (!%p1192_p1)
}
  0x23   :  { %31 = dma.hbm_to_vmem [thread:$0]  %s1615_s1, 16, %s29_s24, [#allocation6]  }
  0x24   :  { %1218 = dma.done.wait [#allocation3], 8192  }
  0x25   :  { %1219 = vsyncadd [#allocation3], 4294959104 }
  0x26   :  { %1220 = dma.done.wait [#allocation6], 16  }
  0x27   :  { %1221 = vsyncadd [#allocation6], 4294967280  ;;  %v1271_v0 = vld [vmem:[#allocation2] sm:$0xff]  ;;  %v1273_v1 = vld [vmem:[#allocation2 + $0x10] sm:$0xff]  ;;  %s1228_s1 = smov [#allocation7]  }
  0x28   :  { %1635 = vst [vmem:[#allocation11_spill] sm:$0xff] %v1273_v1  ;;  %103 = vadd.xlane.f32.xlu0 %v1271_v0  ;;  %107 = vadd.xlane.f32.xlu1 %v1273_v1  ;;  %v1277_v2 = vld [vmem:[#allocation2 + $0x8] sm:$0xff]  ;;  %v1279_v3 = vld [vmem:[#allocation2 + $0x18] sm:$0xff]  ;;  %v1285_v5 = vld [vmem:[#allocation2 + $0x20] sm:$0xff]  ;;  %s947_s7 = sshll.u32 %s1228_s1, 4  ;;  %s948_s7 = int_to_ptr.vmem [resolvable:$true] %s947_s7 }
  0x29   :  { %v1283_v4 = vld [vmem:[#allocation2 + $0x28] sm:$0xff]  ;;  %v1289_v6 = vld [vmem:[#allocation2 + $0x38] sm:$0xff]  ;;  %v1291_v7 = vld [vmem:[#allocation2 + $0x30] sm:$0xff]  ;;  %s1196_s8 = scalar_lea.vmem %s948_s7, 8192  ;;  %p1201_p3 = scmp.lt.s32.totalorder %s948_s7, %s948_s7 }
  0x2a   :  { %v1295_v8 = vld [vmem:[#allocation2 + $0x48] sm:$0xff]  ;;  %v1297_v9 = vld [vmem:[#allocation2 + $0x40] sm:$0xff]  ;;  %v1301_v10 = vld [vmem:[#allocation2 + $0x58] sm:$0xff]  ;;  %p1197_p2 = scmp.ne.s32.totalorder %s948_s7, %s1196_s8  ;;  %p1202_p4 = scmp.lt.s32.totalorder %s1196_s8, %s1196_s8 }
  0x2b   :  { %v1303_v11 = vld [vmem:[#allocation2 + $0x50] sm:$0xff]  ;;  %v1307_v12 = vld [vmem:[#allocation2 + $0x68] sm:$0xff]  ;;  %v1309_v13 = vld [vmem:[#allocation2 + $0x60] sm:$0xff] }
  0x2c   :  { %105 = vadd.xlane.f32.xlu0 %v1277_v2  ;;  %109 = vadd.xlane.f32.xlu1 %v1279_v3  ;;  %v1313_v14 = vld [vmem:[#allocation2 + $0x78] sm:$0xff]  ;;  %v1315_v15 = vld [vmem:[#allocation2 + $0x70] sm:$0xff]  ;;  %v1319_v16 = vld [vmem:[#allocation2 + $0x88] sm:$0xff]  ;;  %p1203_p5 = por %p1202_p4, %p1201_p3 }
  0x2d   :  { %v1321_v17 = vld [vmem:[#allocation2 + $0x80] sm:$0xff]  ;;  %v1325_v18 = vld [vmem:[#allocation2 + $0x98] sm:$0xff]  ;;  %v1327_v19 = vld [vmem:[#allocation2 + $0x90] sm:$0xff] }
  0x2e   :  { %v1331_v20 = vld [vmem:[#allocation2 + $0xa8] sm:$0xff]  ;;  %v1333_v21 = vld [vmem:[#allocation2 + $0xa0] sm:$0xff]  ;;  %v1337_v22 = vld [vmem:[#allocation2 + $0xb8] sm:$0xff]  ;;  %p1204_p6 = pnand %p1203_p5, %p1197_p2 }
  0x2f   :  { %v1339_v23 = vld [vmem:[#allocation2 + $0xb0] sm:$0xff]  ;;  %v1343_v24 = vld [vmem:[#allocation2 + $0xc8] sm:$0xff]  ;;  %v1345_v25 = vld [vmem:[#allocation2 + $0xc0] sm:$0xff] }
  0x30   :  { %113 = vadd.xlane.f32.xlu1 %v1283_v4  ;;  %111 = vadd.xlane.f32.xlu0 %v1285_v5  ;;  %v1349_v26 = vld [vmem:[#allocation2 + $0xd8] sm:$0xff]  ;;  %v1351_v27 = vld [vmem:[#allocation2 + $0xd0] sm:$0xff]  ;;  %v1355_v28 = vld [vmem:[#allocation2 + $0xe8] sm:$0xff] }
  0x31   :  { %v1357_v29 = vld [vmem:[#allocation2 + $0xe0] sm:$0xff]  ;;  %v1361_v30 = vld [vmem:[#allocation2 + $0xf8] sm:$0xff]  ;;  %v1363_v31 = vld [vmem:[#allocation2 + $0xf0] sm:$0xff] }
  0x32   :  { %v1367_v32 = vld [vmem:[#allocation2 + $0x108] sm:$0xff]  ;;  %v1369_v33 = vld [vmem:[#allocation2 + $0x100] sm:$0xff]  ;;  %v1373_v34 = vld [vmem:[#allocation2 + $0x118] sm:$0xff] }
  0x33   :  { %v1375_v35 = vld [vmem:[#allocation2 + $0x110] sm:$0xff]  ;;  %v1379_v36 = vld [vmem:[#allocation2 + $0x128] sm:$0xff]  ;;  %v1381_v37 = vld [vmem:[#allocation2 + $0x120] sm:$0xff] }
  0x34   :  { %117 = vadd.xlane.f32.xlu1 %v1289_v6  ;;  %115 = vadd.xlane.f32.xlu0 %v1291_v7  ;;  %v1385_v38 = vld [vmem:[#allocation2 + $0x138] sm:$0xff]  ;;  %v1387_v39 = vld [vmem:[#allocation2 + $0x130] sm:$0xff]  ;;  %v1391_v40 = vld [vmem:[#allocation2 + $0x148] sm:$0xff] }
  0x35   :  { %v1393_v41 = vld [vmem:[#allocation2 + $0x140] sm:$0xff]  ;;  %v1397_v42 = vld [vmem:[#allocation2 + $0x158] sm:$0xff]  ;;  %v1399_v43 = vld [vmem:[#allocation2 + $0x150] sm:$0xff] }
  0x36   :  { %v1403_v44 = vld [vmem:[#allocation2 + $0x168] sm:$0xff]  ;;  %v1405_v45 = vld [vmem:[#allocation2 + $0x160] sm:$0xff]  ;;  %v1409_v46 = vld [vmem:[#allocation2 + $0x178] sm:$0xff] }
  0x37   :  { %v1411_v47 = vld [vmem:[#allocation2 + $0x170] sm:$0xff]  ;;  %v1415_v48 = vld [vmem:[#allocation2 + $0x188] sm:$0xff]  ;;  %v1417_v49 = vld [vmem:[#allocation2 + $0x180] sm:$0xff] }
  0x38   :  { %121 = vadd.xlane.f32.xlu1 %v1295_v8  ;;  %119 = vadd.xlane.f32.xlu0 %v1297_v9  ;;  %1636 = vst [vmem:[#allocation12_spill] sm:$0xff] %v1411_v47  ;;  %1637 = vst [vmem:[#allocation13_spill] sm:$0xff] %v1415_v48  ;;  %v1421_v50 = vld [vmem:[#allocation2 + $0x198] sm:$0xff]  ;;  %v1423_v51 = vld [vmem:[#allocation2 + $0x190] sm:$0xff] }
  0x39   :  { %1638 = vst [vmem:[#allocation14_spill] sm:$0xff] %v1417_v49  ;;  %1639 = vst [vmem:[#allocation15_spill] sm:$0xff] %v1421_v50  ;;  %v1427_v52 = vld [vmem:[#allocation2 + $0x1a8] sm:$0xff]  ;;  %v1429_v53 = vld [vmem:[#allocation2 + $0x1a0] sm:$0xff] }
  0x3a   :  { %1640 = vst [vmem:[#allocation16_spill] sm:$0xff] %v1423_v51  ;;  %1641 = vst [vmem:[#allocation17_spill] sm:$0xff] %v1427_v52  ;;  %v1433_v54 = vld [vmem:[#allocation2 + $0x1b8] sm:$0xff]  ;;  %v1435_v55 = vld [vmem:[#allocation2 + $0x1b0] sm:$0xff] }
  0x3b   :  { %1642 = vst [vmem:[#allocation18_spill] sm:$0xff] %v1429_v53  ;;  %1643 = vst [vmem:[#allocation19_spill] sm:$0xff] %v1433_v54  ;;  %v1439_v56 = vld [vmem:[#allocation2 + $0x1c8] sm:$0xff]  ;;  %v1441_v57 = vld [vmem:[#allocation2 + $0x1c0] sm:$0xff] }
  0x3c   :  { %125 = vadd.xlane.f32.xlu1 %v1301_v10  ;;  %123 = vadd.xlane.f32.xlu0 %v1303_v11  ;;  %1644 = vst [vmem:[#allocation20_spill] sm:$0xff] %v1435_v55  ;;  %1645 = vst [vmem:[#allocation21_spill] sm:$0xff] %v1439_v56  ;;  %v1445_v58 = vld [vmem:[#allocation2 + $0x1d8] sm:$0xff]  ;;  %v1447_v59 = vld [vmem:[#allocation2 + $0x1d0] sm:$0xff] }
  0x3d   :  { %1646 = vst [vmem:[#allocation22_spill] sm:$0xff] %v1441_v57  ;;  %1647 = vst [vmem:[#allocation23_spill] sm:$0xff] %v1445_v58  ;;  %v1451_v60 = vld [vmem:[#allocation2 + $0x1e8] sm:$0xff]  ;;  %v1453_v61 = vld [vmem:[#allocation2 + $0x1e0] sm:$0xff] }
  0x3e   :  { %1648 = vst [vmem:[#allocation24_spill] sm:$0xff] %v1447_v59  ;;  %1649 = vst [vmem:[#allocation25_spill] sm:$0xff] %v1451_v60  ;;  %v1457_v62 = vld [vmem:[#allocation2 + $0x1f8] sm:$0xff]  ;;  %v1459_v63 = vld [vmem:[#allocation2 + $0x1f0] sm:$0xff] }
  0x3f   :  { %1650 = vst [vmem:[#allocation26_spill] sm:$0xff] %v1453_v61  ;;  %1651 = vst [vmem:[#allocation27_spill] sm:$0xff] %v1457_v62 }
  0x40   :  { %129 = vadd.xlane.f32.xlu1 %v1307_v12  ;;  %127 = vadd.xlane.f32.xlu0 %v1309_v13  ;;  %1652 = vst [vmem:[#allocation28_spill] sm:$0xff] %v1459_v63 }
  0x44   :  { %133 = vadd.xlane.f32.xlu1 %v1313_v14  ;;  %131 = vadd.xlane.f32.xlu0 %v1315_v15 }
  0x48   :  { %137 = vadd.xlane.f32.xlu1 %v1319_v16  ;;  %135 = vadd.xlane.f32.xlu0 %v1321_v17 }
  0x4c   :  { %141 = vadd.xlane.f32.xlu1 %v1325_v18  ;;  %139 = vadd.xlane.f32.xlu0 %v1327_v19 }
  0x50   :  { %145 = vadd.xlane.f32.xlu1 %v1331_v20  ;;  %143 = vadd.xlane.f32.xlu0 %v1333_v21 }
  0x54   :  { %149 = vadd.xlane.f32.xlu1 %v1337_v22  ;;  %147 = vadd.xlane.f32.xlu0 %v1339_v23 }
  0x58   :  { %153 = vadd.xlane.f32.xlu1 %v1343_v24  ;;  %151 = vadd.xlane.f32.xlu0 %v1345_v25 }
  0x5c   :  { %157 = vadd.xlane.f32.xlu1 %v1349_v26  ;;  %155 = vadd.xlane.f32.xlu0 %v1351_v27 }
  0x60   :  { %161 = vadd.xlane.f32.xlu1 %v1355_v28  ;;  %159 = vadd.xlane.f32.xlu0 %v1357_v29 }
  0x64   :  { %165 = vadd.xlane.f32.xlu1 %v1361_v30  ;;  %163 = vadd.xlane.f32.xlu0 %v1363_v31 }
  0x68   :  { %169 = vadd.xlane.f32.xlu1 %v1367_v32  ;;  %167 = vadd.xlane.f32.xlu0 %v1369_v33 }
  0x6c   :  { %173 = vadd.xlane.f32.xlu1 %v1373_v34  ;;  %171 = vadd.xlane.f32.xlu0 %v1375_v35 }
  0x70   :  { %177 = vadd.xlane.f32.xlu1 %v1379_v36  ;;  %175 = vadd.xlane.f32.xlu0 %v1381_v37 }
  0x74   :  { %181 = vadd.xlane.f32.xlu1 %v1385_v38  ;;  %179 = vadd.xlane.f32.xlu0 %v1387_v39 }
  0x78   :  { %185 = vadd.xlane.f32.xlu1 %v1391_v40  ;;  %183 = vadd.xlane.f32.xlu0 %v1393_v41 }
  0x7c   :  { %189 = vadd.xlane.f32.xlu1 %v1397_v42  ;;  %187 = vadd.xlane.f32.xlu0 %v1399_v43 }
  0x80   :  { %193 = vadd.xlane.f32.xlu1 %v1403_v44  ;;  %191 = vadd.xlane.f32.xlu0 %v1405_v45 }
  0x84   :  { %197 = vadd.xlane.f32.xlu1 %v1409_v46  ;;  %195 = vadd.xlane.f32.xlu0 %v1411_v47 }
  0x88   :  { %201 = vadd.xlane.f32.xlu1 %v1415_v48  ;;  %199 = vadd.xlane.f32.xlu0 %v1417_v49 }
  0x8c   :  { %205 = vadd.xlane.f32.xlu1 %v1421_v50  ;;  %203 = vadd.xlane.f32.xlu0 %v1423_v51 }
  0x90   :  { %209 = vadd.xlane.f32.xlu1 %v1427_v52  ;;  %207 = vadd.xlane.f32.xlu0 %v1429_v53 }
  0x94   :  { %213 = vadd.xlane.f32.xlu1 %v1433_v54  ;;  %211 = vadd.xlane.f32.xlu0 %v1435_v55 }
  0x98   :  { %217 = vadd.xlane.f32.xlu1 %v1439_v56  ;;  %215 = vadd.xlane.f32.xlu0 %v1441_v57 }
  0x9c   :  { %221 = vadd.xlane.f32.xlu1 %v1445_v58  ;;  %219 = vadd.xlane.f32.xlu0 %v1447_v59 }
  0xa0   :  { %225 = vadd.xlane.f32.xlu1 %v1451_v60  ;;  %223 = vadd.xlane.f32.xlu0 %v1453_v61 }
  0xa4   :  { %229 = vadd.xlane.f32.xlu1 %v1457_v62  ;;  %227 = vadd.xlane.f32.xlu0 %v1459_v63 }
  0xb5   :  { %v104_v57 = vpop.xlane.xlu0 %103  ;;  %v108_v58 = vpop.xlane.xlu1 %107 }
  0xb6   :  { %v232_v56 = vmul.f32 0.0078125, %v104_v57  ;;  %v234_v59 = vmul.f32 0.0078125, %v108_v58 }
  0xb8   :  { %v296_v55 = vsub.f32 %v1271_v0, %v232_v56  ;;  %v298_v54 = vsub.f32 %v1273_v1, %v234_v59 }
  0xb9   :  { %v106_v53 = vpop.xlane.xlu0 %105  ;;  %v110_v60 = vpop.xlane.xlu1 %109 }
  0xba   :  { %v233_v52 = vmul.f32 0.0078125, %v106_v53  ;;  %v360_v61 = vmul.f32 %v296_v55, %v296_v55  ;;  %v235_v51 = vmul.f32 0.0078125, %v110_v60  ;;  %v362_v50 = vmul.f32 %v298_v54, %v298_v54 }
  0xbc   :  { %424 = vadd.xlane.f32.xlu0 %v360_v61  ;;  %v297_v49 = vsub.f32 %v1277_v2, %v233_v52  ;;  %v299_v62 = vsub.f32 %v1279_v3, %v235_v51 }
  0xbd   :  { %v114_v63 = vpop.xlane.xlu1 %113  ;;  %v112_v48 = vpop.xlane.xlu0 %111 }
  0xbe   :  { %v361_v47 = vmul.f32 %v297_v49, %v297_v49  ;;  %v237_v57 = vmul.f32 0.0078125, %v114_v63  ;;  %v236_v58 = vmul.f32 0.0078125, %v112_v48  ;;  %v363_v56 = vmul.f32 %v299_v62, %v299_v62 }
  0xc0   :  { %428 = vadd.xlane.f32.xlu0 %v362_v50  ;;  %426 = vadd.xlane.f32.xlu1 %v361_v47  ;;  %v301_v59 = vsub.f32 %v1283_v4, %v237_v57  ;;  %v300_v53 = vsub.f32 %v1285_v5, %v236_v58 }
  0xc1   :  { %v118_v55 = vpop.xlane.xlu1 %117  ;;  %v116_v60 = vpop.xlane.xlu0 %115 }
  0xc2   :  { %v239_v61 = vmul.f32 0.0078125, %v118_v55  ;;  %v238_v54 = vmul.f32 0.0078125, %v116_v60  ;;  %v364_v1 = vmul.f32 %v300_v53, %v300_v53  ;;  %v365_v52 = vmul.f32 %v301_v59, %v301_v59 }
  0xc4   :  { %430 = vadd.xlane.f32.xlu1 %v363_v56  ;;  %432 = vadd.xlane.f32.xlu0 %v364_v1  ;;  %v303_v51 = vsub.f32 %v1289_v6, %v239_v61  ;;  %v302_v49 = vsub.f32 %v1291_v7, %v238_v54 }
  0xc5   :  { %v122_v48 = vpop.xlane.xlu1 %121  ;;  %v120_v50 = vpop.xlane.xlu0 %119 }
  0xc6   :  { %v241_v47 = vmul.f32 0.0078125, %v122_v48  ;;  %v240_v62 = vmul.f32 0.0078125, %v120_v50  ;;  %v366_v63 = vmul.f32 %v302_v49, %v302_v49  ;;  %v367_v4 = vmul.f32 %v303_v51, %v303_v51 }
  0xc8   :  { %434 = vadd.xlane.f32.xlu1 %v365_v52  ;;  %436 = vadd.xlane.f32.xlu0 %v366_v63  ;;  %v305_v57 = vsub.f32 %v1295_v8, %v241_v47  ;;  %v304_v58 = vsub.f32 %v1297_v9, %v240_v62 }
  0xc9   :  { %v126_v53 = vpop.xlane.xlu1 %125  ;;  %v124_v56 = vpop.xlane.xlu0 %123 }
  0xca   :  { %v243_v59 = vmul.f32 0.0078125, %v126_v53  ;;  %v242_v1 = vmul.f32 0.0078125, %v124_v56  ;;  %v368_v55 = vmul.f32 %v304_v58, %v304_v58  ;;  %v369_v6 = vmul.f32 %v305_v57, %v305_v57 }
  0xcc   :  { %438 = vadd.xlane.f32.xlu1 %v367_v4  ;;  %440 = vadd.xlane.f32.xlu0 %v368_v55  ;;  %v307_v60 = vsub.f32 %v1301_v10, %v243_v59  ;;  %v306_v61 = vsub.f32 %v1303_v11, %v242_v1 }
  0xcd   :  { %v130_v54 = vpop.xlane.xlu1 %129  ;;  %v128_v52 = vpop.xlane.xlu0 %127 }
  0xce   :  { %v245_v51 = vmul.f32 0.0078125, %v130_v54  ;;  %v244_v49 = vmul.f32 0.0078125, %v128_v52  ;;  %v370_v48 = vmul.f32 %v306_v61, %v306_v61  ;;  %v371_v8 = vmul.f32 %v307_v60, %v307_v60 }
  0xd0   :  { %442 = vadd.xlane.f32.xlu1 %v369_v6  ;;  %444 = vadd.xlane.f32.xlu0 %v370_v48  ;;  %v309_v9 = vsub.f32 %v1307_v12, %v245_v51  ;;  %v308_v50 = vsub.f32 %v1309_v13, %v244_v49 }
  0xd1   :  { %v134_v47 = vpop.xlane.xlu1 %133  ;;  %v132_v62 = vpop.xlane.xlu0 %131 }
  0xd2   :  { %v247_v63 = vmul.f32 0.0078125, %v134_v47  ;;  %v246_v4 = vmul.f32 0.0078125, %v132_v62  ;;  %v372_v57 = vmul.f32 %v308_v50, %v308_v50  ;;  %v373_v10 = vmul.f32 %v309_v9, %v309_v9 }
  0xd4   :  { %446 = vadd.xlane.f32.xlu1 %v371_v8  ;;  %448 = vadd.xlane.f32.xlu0 %v372_v57  ;;  %v311_v11 = vsub.f32 %v1313_v14, %v247_v63  ;;  %v310_v58 = vsub.f32 %v1315_v15, %v246_v4 }
  0xd5   :  { %v138_v53 = vpop.xlane.xlu1 %137  ;;  %v136_v56 = vpop.xlane.xlu0 %135 }
  0xd6   :  { %v249_v59 = vmul.f32 0.0078125, %v138_v53  ;;  %v248_v1 = vmul.f32 0.0078125, %v136_v56  ;;  %v374_v55 = vmul.f32 %v310_v58, %v310_v58  ;;  %v375_v12 = vmul.f32 %v311_v11, %v311_v11 }
  0xd8   :  { %450 = vadd.xlane.f32.xlu1 %v373_v10  ;;  %452 = vadd.xlane.f32.xlu0 %v374_v55  ;;  %v313_v13 = vsub.f32 %v1319_v16, %v249_v59  ;;  %v312_v6 = vsub.f32 %v1321_v17, %v248_v1 }
  0xd9   :  { %v142_v60 = vpop.xlane.xlu1 %141  ;;  %v140_v61 = vpop.xlane.xlu0 %139 }
  0xda   :  { %v251_v54 = vmul.f32 0.0078125, %v142_v60  ;;  %v250_v52 = vmul.f32 0.0078125, %v140_v61  ;;  %v376_v51 = vmul.f32 %v312_v6, %v312_v6  ;;  %v377_v14 = vmul.f32 %v313_v13, %v313_v13 }
  0xdc   :  { %454 = vadd.xlane.f32.xlu1 %v375_v12  ;;  %456 = vadd.xlane.f32.xlu0 %v376_v51  ;;  %v315_v15 = vsub.f32 %v1325_v18, %v251_v54  ;;  %v314_v49 = vsub.f32 %v1327_v19, %v250_v52 }
  0xdd   :  { %v146_v48 = vpop.xlane.xlu1 %145  ;;  %v144_v8 = vpop.xlane.xlu0 %143 }
  0xde   :  { %v253_v9 = vmul.f32 0.0078125, %v146_v48  ;;  %v252_v50 = vmul.f32 0.0078125, %v144_v8  ;;  %v378_v47 = vmul.f32 %v314_v49, %v314_v49  ;;  %v379_v16 = vmul.f32 %v315_v15, %v315_v15 }
  0xe0   :  { %458 = vadd.xlane.f32.xlu1 %v377_v14  ;;  %460 = vadd.xlane.f32.xlu0 %v378_v47  ;;  %v317_v17 = vsub.f32 %v1331_v20, %v253_v9  ;;  %v316_v62 = vsub.f32 %v1333_v21, %v252_v50 }
  0xe1   :  { %v150_v63 = vpop.xlane.xlu1 %149  ;;  %v148_v4 = vpop.xlane.xlu0 %147 }
  0xe2   :  { %v255_v57 = vmul.f32 0.0078125, %v150_v63  ;;  %v254_v10 = vmul.f32 0.0078125, %v148_v4  ;;  %v380_v11 = vmul.f32 %v316_v62, %v316_v62  ;;  %v381_v18 = vmul.f32 %v317_v17, %v317_v17 }
  0xe4   :  { %462 = vadd.xlane.f32.xlu1 %v379_v16  ;;  %464 = vadd.xlane.f32.xlu0 %v380_v11  ;;  %v319_v19 = vsub.f32 %v1337_v22, %v255_v57  ;;  %v318_v58 = vsub.f32 %v1339_v23, %v254_v10 }
  0xe5   :  { %v154_v53 = vpop.xlane.xlu1 %153  ;;  %v152_v56 = vpop.xlane.xlu0 %151 }
  0xe6   :  { %v257_v59 = vmul.f32 0.0078125, %v154_v53  ;;  %v256_v1 = vmul.f32 0.0078125, %v152_v56  ;;  %v382_v55 = vmul.f32 %v318_v58, %v318_v58  ;;  %v383_v20 = vmul.f32 %v319_v19, %v319_v19 }
  0xe8   :  { %466 = vadd.xlane.f32.xlu1 %v381_v18  ;;  %468 = vadd.xlane.f32.xlu0 %v382_v55  ;;  %v321_v21 = vsub.f32 %v1343_v24, %v257_v59  ;;  %v320_v12 = vsub.f32 %v1345_v25, %v256_v1 }
  0xe9   :  { %v158_v13 = vpop.xlane.xlu1 %157  ;;  %v156_v6 = vpop.xlane.xlu0 %155 }
  0xea   :  { %v259_v60 = vmul.f32 0.0078125, %v158_v13  ;;  %v258_v61 = vmul.f32 0.0078125, %v156_v6  ;;  %v384_v54 = vmul.f32 %v320_v12, %v320_v12  ;;  %v385_v22 = vmul.f32 %v321_v21, %v321_v21 }
  0xec   :  { %470 = vadd.xlane.f32.xlu1 %v383_v20  ;;  %472 = vadd.xlane.f32.xlu0 %v384_v54  ;;  %v323_v23 = vsub.f32 %v1349_v26, %v259_v60  ;;  %v322_v52 = vsub.f32 %v1351_v27, %v258_v61 }
  0xed   :  { %v162_v51 = vpop.xlane.xlu1 %161  ;;  %v160_v14 = vpop.xlane.xlu0 %159 }
  0xee   :  { %v261_v15 = vmul.f32 0.0078125, %v162_v51  ;;  %v260_v49 = vmul.f32 0.0078125, %v160_v14  ;;  %v386_v48 = vmul.f32 %v322_v52, %v322_v52  ;;  %v387_v24 = vmul.f32 %v323_v23, %v323_v23 }
  0xf0   :  { %474 = vadd.xlane.f32.xlu1 %v385_v22  ;;  %476 = vadd.xlane.f32.xlu0 %v386_v48  ;;  %v325_v25 = vsub.f32 %v1355_v28, %v261_v15  ;;  %v324_v8 = vsub.f32 %v1357_v29, %v260_v49 }
  0xf1   :  { %v166_v9 = vpop.xlane.xlu1 %165  ;;  %v164_v50 = vpop.xlane.xlu0 %163 }
  0xf2   :  { %v263_v47 = vmul.f32 0.0078125, %v166_v9  ;;  %v262_v16 = vmul.f32 0.0078125, %v164_v50  ;;  %v388_v17 = vmul.f32 %v324_v8, %v324_v8  ;;  %v389_v26 = vmul.f32 %v325_v25, %v325_v25 }
  0xf4   :  { %478 = vadd.xlane.f32.xlu1 %v387_v24  ;;  %480 = vadd.xlane.f32.xlu0 %v388_v17  ;;  %v327_v27 = vsub.f32 %v1361_v30, %v263_v47  ;;  %v326_v62 = vsub.f32 %v1363_v31, %v262_v16 }
  0xf5   :  { %v170_v63 = vpop.xlane.xlu1 %169  ;;  %v168_v4 = vpop.xlane.xlu0 %167 }
  0xf6   :  { %v265_v57 = vmul.f32 0.0078125, %v170_v63  ;;  %v264_v10 = vmul.f32 0.0078125, %v168_v4  ;;  %v390_v11 = vmul.f32 %v326_v62, %v326_v62  ;;  %v391_v28 = vmul.f32 %v327_v27, %v327_v27 }
  0xf8   :  { %482 = vadd.xlane.f32.xlu1 %v389_v26  ;;  %484 = vadd.xlane.f32.xlu0 %v390_v11  ;;  %v329_v29 = vsub.f32 %v1367_v32, %v265_v57  ;;  %v328_v18 = vsub.f32 %v1369_v33, %v264_v10 }
  0xf9   :  { %v174_v19 = vpop.xlane.xlu1 %173  ;;  %v172_v58 = vpop.xlane.xlu0 %171 }
  0xfa   :  { %v267_v53 = vmul.f32 0.0078125, %v174_v19  ;;  %v266_v56 = vmul.f32 0.0078125, %v172_v58  ;;  %v392_v59 = vmul.f32 %v328_v18, %v328_v18  ;;  %v393_v1 = vmul.f32 %v329_v29, %v329_v29  ;;  %v1653_v18 = vld [vmem:[#allocation12_spill] sm:$0xff] }
  0xfc   :  { %486 = vadd.xlane.f32.xlu1 %v391_v28  ;;  %v331_v30 = vsub.f32 %v1373_v34, %v267_v53  ;;  %v330_v31 = vsub.f32 %v1375_v35, %v266_v56  ;;  %488 = vadd.xlane.f32.xlu0 %v392_v59 }
  0xfd   :  { %v178_v55 = vpop.xlane.xlu1 %177  ;;  %v176_v20 = vpop.xlane.xlu0 %175 }
  0xfe   :  { %v394_v21 = vmul.f32 %v330_v31, %v330_v31  ;;  %v269_v12 = vmul.f32 0.0078125, %v178_v55  ;;  %v268_v13 = vmul.f32 0.0078125, %v176_v20  ;;  %v395_v32 = vmul.f32 %v331_v30, %v331_v30 }
 0x100   :  { %490 = vadd.xlane.f32.xlu1 %v393_v1  ;;  %v333_v33 = vsub.f32 %v1379_v36, %v269_v12  ;;  %v332_v6 = vsub.f32 %v1381_v37, %v268_v13  ;;  %492 = vadd.xlane.f32.xlu0 %v394_v21  ;;  %v1655_v1 = vld [vmem:[#allocation14_spill] sm:$0xff] }
 0x101   :  { %v182_v60 = vpop.xlane.xlu1 %181  ;;  %v180_v61 = vpop.xlane.xlu0 %179 }
 0x102   :  { %v396_v54 = vmul.f32 %v332_v6, %v332_v6  ;;  %v271_v34 = vmul.f32 0.0078125, %v182_v60  ;;  %v270_v22 = vmul.f32 0.0078125, %v180_v61  ;;  %v397_v35 = vmul.f32 %v333_v33, %v333_v33  ;;  %v1656_v33 = vld [vmem:[#allocation15_spill] sm:$0xff]  ;;  %v1657_v60 = vld [vmem:[#allocation16_spill] sm:$0xff] }
 0x104   :  { %494 = vadd.xlane.f32.xlu1 %v395_v32  ;;  %v335_v23 = vsub.f32 %v1385_v38, %v271_v34  ;;  %v334_v52 = vsub.f32 %v1387_v39, %v270_v22  ;;  %496 = vadd.xlane.f32.xlu0 %v396_v54 }
 0x105   :  { %v186_v51 = vpop.xlane.xlu1 %185  ;;  %v184_v14 = vpop.xlane.xlu0 %183 }
 0x106   :  { %v398_v15 = vmul.f32 %v334_v52, %v334_v52  ;;  %v273_v49 = vmul.f32 0.0078125, %v186_v51  ;;  %v272_v36 = vmul.f32 0.0078125, %v184_v14  ;;  %v399_v48 = vmul.f32 %v335_v23, %v335_v23  ;;  %v1658_v51 = vld [vmem:[#allocation17_spill] sm:$0xff] }
 0x108   :  { %498 = vadd.xlane.f32.xlu1 %v397_v35  ;;  %v337_v37 = vsub.f32 %v1391_v40, %v273_v49  ;;  %v336_v24 = vsub.f32 %v1393_v41, %v272_v36  ;;  %500 = vadd.xlane.f32.xlu0 %v398_v15  ;;  %v1659_v15 = vld [vmem:[#allocation18_spill] sm:$0xff] }
 0x109   :  { %v190_v25 = vpop.xlane.xlu1 %189  ;;  %v188_v8 = vpop.xlane.xlu0 %187 }
 0x10a   :  { %v400_v9 = vmul.f32 %v336_v24, %v336_v24  ;;  %v275_v50 = vmul.f32 0.0078125, %v190_v25  ;;  %v274_v38 = vmul.f32 0.0078125, %v188_v8  ;;  %v401_v47 = vmul.f32 %v337_v37, %v337_v37 }
 0x10c   :  { %502 = vadd.xlane.f32.xlu1 %v399_v48  ;;  %v339_v39 = vsub.f32 %v1397_v42, %v275_v50  ;;  %v338_v16 = vsub.f32 %v1399_v43, %v274_v38  ;;  %504 = vadd.xlane.f32.xlu0 %v400_v9  ;;  %v1660_v9 = vld [vmem:[#allocation19_spill] sm:$0xff]  ;;  %v1661_v38 = vld [vmem:[#allocation20_spill] sm:$0xff] }
 0x10d   :  { %v194_v17 = vpop.xlane.xlu1 %193  ;;  %v192_v26 = vpop.xlane.xlu0 %191 }
 0x10e   :  { %v402_v27 = vmul.f32 %v338_v16, %v338_v16  ;;  %v277_v62 = vmul.f32 0.0078125, %v194_v17  ;;  %v276_v40 = vmul.f32 0.0078125, %v192_v26  ;;  %v403_v63 = vmul.f32 %v339_v39, %v339_v39 }
 0x110   :  { %506 = vadd.xlane.f32.xlu1 %v401_v47  ;;  %v341_v41 = vsub.f32 %v1403_v44, %v277_v62  ;;  %v340_v4 = vsub.f32 %v1405_v45, %v276_v40  ;;  %508 = vadd.xlane.f32.xlu0 %v402_v27  ;;  %v1654_v45 = vld [vmem:[#allocation13_spill] sm:$0xff] }
 0x111   :  { %v198_v57 = vpop.xlane.xlu1 %197  ;;  %v196_v10 = vpop.xlane.xlu0 %195  ;;  %v1662_v40 = vld [vmem:[#allocation21_spill] sm:$0xff] }
 0x112   :  { %v404_v11 = vmul.f32 %v340_v4, %v340_v4  ;;  %v279_v28 = vmul.f32 0.0078125, %v198_v57  ;;  %v278_v42 = vmul.f32 0.0078125, %v196_v10  ;;  %v405_v29 = vmul.f32 %v341_v41, %v341_v41  ;;  %v1663_v41 = vld [vmem:[#allocation22_spill] sm:$0xff] }
 0x114   :  { %510 = vadd.xlane.f32.xlu1 %v403_v63  ;;  %v343_v43 = vsub.f32 %v1409_v46, %v279_v28  ;;  %v342_v19 = vsub.f32 %v1653_v18, %v278_v42  ;;  %512 = vadd.xlane.f32.xlu0 %v404_v11 }
 0x115   :  { %v202_v58 = vpop.xlane.xlu1 %201  ;;  %v200_v53 = vpop.xlane.xlu0 %199 }
 0x116   :  { %v406_v56 = vmul.f32 %v342_v19, %v342_v19  ;;  %v281_v59 = vmul.f32 0.0078125, %v202_v58  ;;  %v280_v44 = vmul.f32 0.0078125, %v200_v53  ;;  %v407_v30 = vmul.f32 %v343_v43, %v343_v43  ;;  %v1664_v43 = vld [vmem:[#allocation23_spill] sm:$0xff]  ;;  %v1665_v19 = vld [vmem:[#allocation24_spill] sm:$0xff] }
 0x118   :  { %514 = vadd.xlane.f32.xlu1 %v405_v29  ;;  %v345_v31 = vsub.f32 %v1654_v45, %v281_v59  ;;  %v344_v55 = vsub.f32 %v1655_v1, %v280_v44  ;;  %516 = vadd.xlane.f32.xlu0 %v406_v56 }
 0x119   :  { %v206_v20 = vpop.xlane.xlu1 %205  ;;  %v204_v21 = vpop.xlane.xlu0 %203 }
 0x11a   :  { %v408_v12 = vmul.f32 %v344_v55, %v344_v55  ;;  %v283_v13 = vmul.f32 0.0078125, %v206_v20  ;;  %v282_v46 = vmul.f32 0.0078125, %v204_v21  ;;  %v409_v32 = vmul.f32 %v345_v31, %v345_v31  ;;  %v1666_v31 = vld [vmem:[#allocation25_spill] sm:$0xff]  ;;  %v1667_v55 = vld [vmem:[#allocation26_spill] sm:$0xff] }
 0x11c   :  { %518 = vadd.xlane.f32.xlu1 %v407_v30  ;;  %v347_v6 = vsub.f32 %v1656_v33, %v283_v13  ;;  %v346_v61 = vsub.f32 %v1657_v60, %v282_v46  ;;  %520 = vadd.xlane.f32.xlu0 %v408_v12 }
 0x11d   :  { %v210_v54 = vpop.xlane.xlu1 %209  ;;  %v208_v34 = vpop.xlane.xlu0 %207 }
 0x11e   :  { %v410_v22 = vmul.f32 %v346_v61, %v346_v61  ;;  %v285_v35 = vmul.f32 0.0078125, %v210_v54  ;;  %v284_v23 = vmul.f32 0.0078125, %v208_v34  ;;  %v411_v52 = vmul.f32 %v347_v6, %v347_v6  ;;  %v1668_v6 = vld [vmem:[#allocation27_spill] sm:$0xff]  ;;  %v1669_v61 = vld [vmem:[#allocation28_spill] sm:$0xff] }
 0x120   :  { %522 = vadd.xlane.f32.xlu1 %v409_v32  ;;  %v349_v14 = vsub.f32 %v1658_v51, %v285_v35  ;;  %v348_v49 = vsub.f32 %v1659_v15, %v284_v23  ;;  %524 = vadd.xlane.f32.xlu0 %v410_v22 }
 0x121   :  { %v214_v36 = vpop.xlane.xlu1 %213  ;;  %v212_v48 = vpop.xlane.xlu0 %211 }
 0x122   :  { %v412_v37 = vmul.f32 %v348_v49, %v348_v49  ;;  %v287_v24 = vmul.f32 0.0078125, %v214_v36  ;;  %v286_v25 = vmul.f32 0.0078125, %v212_v48  ;;  %v413_v8 = vmul.f32 %v349_v14, %v349_v14 }
 0x124   :  { %526 = vadd.xlane.f32.xlu1 %v411_v52  ;;  %v351_v50 = vsub.f32 %v1660_v9, %v287_v24  ;;  %v350_v47 = vsub.f32 %v1661_v38, %v286_v25  ;;  %528 = vadd.xlane.f32.xlu0 %v412_v37 }
 0x125   :  { %v218_v39 = vpop.xlane.xlu1 %217  ;;  %v216_v16 = vpop.xlane.xlu0 %215 }
 0x126   :  { %v414_v17 = vmul.f32 %v350_v47, %v350_v47  ;;  %v289_v26 = vmul.f32 0.0078125, %v218_v39  ;;  %v288_v27 = vmul.f32 0.0078125, %v216_v16  ;;  %v415_v62 = vmul.f32 %v351_v50, %v351_v50 }
 0x128   :  { %530 = vadd.xlane.f32.xlu1 %v413_v8  ;;  %v353_v63 = vsub.f32 %v1662_v40, %v289_v26  ;;  %v352_v4 = vsub.f32 %v1663_v41, %v288_v27  ;;  %532 = vadd.xlane.f32.xlu0 %v414_v17  ;;  %v1527_v26 = vld [vmem:[#allocation5] ss:$0 sm:$0xff] }
 0x129   :  { %v222_v57 = vpop.xlane.xlu1 %221  ;;  %v220_v10 = vpop.xlane.xlu0 %219 }
 0x12a   :  { %v416_v11 = vmul.f32 %v352_v4, %v352_v4  ;;  %v291_v28 = vmul.f32 0.0078125, %v222_v57  ;;  %v290_v42 = vmul.f32 0.0078125, %v220_v10  ;;  %v417_v29 = vmul.f32 %v353_v63, %v353_v63 }
 0x12c   :  { %534 = vadd.xlane.f32.xlu1 %v415_v62  ;;  %v355_v18 = vsub.f32 %v1664_v43, %v291_v28  ;;  %v354_v58 = vsub.f32 %v1665_v19, %v290_v42  ;;  %536 = vadd.xlane.f32.xlu0 %v416_v11 }
 0x12d   :  { %v226_v53 = vpop.xlane.xlu1 %225  ;;  %v224_v56 = vpop.xlane.xlu0 %223 }
 0x12e   :  { %v418_v59 = vmul.f32 %v354_v58, %v354_v58  ;;  %v293_v44 = vmul.f32 0.0078125, %v226_v53  ;;  %v292_v30 = vmul.f32 0.0078125, %v224_v56  ;;  %v419_v45 = vmul.f32 %v355_v18, %v355_v18  ;;  %v1670_v58 = vld [vmem:[#allocation11_spill] sm:$0xff] }
 0x130   :  { %538 = vadd.xlane.f32.xlu1 %v417_v29  ;;  %v357_v1 = vsub.f32 %v1666_v31, %v293_v44  ;;  %v356_v20 = vsub.f32 %v1667_v55, %v292_v30  ;;  %540 = vadd.xlane.f32.xlu0 %v418_v59 }
 0x131   :  { %v230_v21 = vpop.xlane.xlu1 %229  ;;  %v228_v12 = vpop.xlane.xlu0 %227 }
 0x132   :  { %v420_v13 = vmul.f32 %v356_v20, %v356_v20  ;;  %v295_v46 = vmul.f32 0.0078125, %v230_v21  ;;  %v294_v32 = vmul.f32 0.0078125, %v228_v12  ;;  %v421_v33 = vmul.f32 %v357_v1, %v357_v1 }
 0x134   :  { %542 = vadd.xlane.f32.xlu1 %v419_v45  ;;  %v359_v60 = vsub.f32 %v1668_v6, %v295_v46  ;;  %v358_v54 = vsub.f32 %v1669_v61, %v294_v32  ;;  %544 = vadd.xlane.f32.xlu0 %v420_v13 }
 0x136   :  { %v422_v34 = vmul.f32 %v358_v54, %v358_v54  ;;  %v423_v22 = vmul.f32 %v359_v60, %v359_v60  ;;  %v1094_v54 = vld [vmem:[#allocation2 + $0x28] sm:$0xff] }
 0x138   :  { %546 = vadd.xlane.f32.xlu1 %v421_v33  ;;  %548 = vadd.xlane.f32.xlu0 %v422_v34 }
 0x13c   :  { %550 = vadd.xlane.f32.xlu1 %v423_v22 }
 0x149   :  { %v425_v35 = vpop.xlane.xlu0 %424 }
 0x14a   :  { %v552_v23 = vmul.f32 0.0078125, %v425_v35 }
 0x14c   :  { %v616_v52 = vadd.f32 1e-05, %v552_v23 }
 0x14d   :  { %v427_v51 = vpop.xlane.xlu1 %426  ;;  %v429_v14 = vpop.xlane.xlu0 %428 }
 0x14e   :  { %966 = vrsqrt.f32 %v616_v52  ;;  %v553_v15 = vmul.f32 0.0078125, %v427_v51  ;;  %v554_v49 = vmul.f32 0.0078125, %v429_v14 }
 0x150   :  { %v617_v36 = vadd.f32 1e-05, %v553_v15  ;;  %v618_v48 = vadd.f32 1e-05, %v554_v49 }
 0x151   :  { %v431_v37 = vpop.xlane.xlu1 %430  ;;  %v433_v24 = vpop.xlane.xlu0 %432 }
 0x152   :  { %968 = vrsqrt.f32 %v617_v36  ;;  %v555_v25 = vmul.f32 0.0078125, %v431_v37  ;;  %v556_v8 = vmul.f32 0.0078125, %v433_v24 }
 0x153   :  { %970 = vrsqrt.f32 %v618_v48  ;;  %v1095_v48 = vld [vmem:[#allocation2 + $0x38] sm:$0xff] }
 0x154   :  { %v619_v9 = vadd.f32 1e-05, %v555_v25  ;;  %v620_v50 = vadd.f32 1e-05, %v556_v8  ;;  %v1096_v8 = vld [vmem:[#allocation2 + $0x40] sm:$0xff] }
 0x155   :  { %v435_v38 = vpop.xlane.xlu1 %434  ;;  %v437_v47 = vpop.xlane.xlu0 %436 }
 0x156   :  { %972 = vrsqrt.f32 %v619_v9  ;;  %v557_v39 = vmul.f32 0.0078125, %v435_v38  ;;  %v558_v16 = vmul.f32 0.0078125, %v437_v47 }
 0x157   :  { %974 = vrsqrt.f32 %v620_v50 }
 0x158   :  { %v967_v17 = vpop.eup %966  ;;  %v621_v27 = vadd.f32 1e-05, %v557_v39  ;;  %v622_v62 = vadd.f32 1e-05, %v558_v16 }
 0x159   :  { %v744_v40 = vmul.f32 %v967_v17, %v1271_v0  ;;  %v439_v63 = vpop.xlane.xlu1 %438  ;;  %v441_v41 = vpop.xlane.xlu0 %440 }
 0x15a   :  { %976 = vrsqrt.f32 %v621_v27  ;;  %v559_v4 = vmul.f32 0.0078125, %v439_v63  ;;  %v560_v57 = vmul.f32 0.0078125, %v441_v41 }
 0x15b   :  { %v814_v10 = vmul.f32 %v1527_v26, %v744_v40  ;;  %978 = vrsqrt.f32 %v622_v62  ;;  %v1097_v62 = vld [vmem:[#allocation2 + $0x48] sm:$0xff] }
 0x15c   :  { %v969_v11 = vpop.eup %968  ;;  %v623_v28 = vadd.f32 1e-05, %v559_v4  ;;  %v624_v42 = vadd.f32 1e-05, %v560_v57  ;;  %v1098_v4 = vld [vmem:[#allocation2 + $0x50] sm:$0xff] }
 0x15d   :  { %v971_v29 = vpop.eup %970  ;;  %878 = vst [vmem:[#allocation7] sm:$0xff] %v814_v10  ;;  %v745_v43 = vmul.f32 %v969_v11, %v1277_v2  ;;  %v443_v18 = vpop.xlane.xlu1 %442 }
 0x15e   :  { %v445_v19 = vpop.xlane.xlu0 %444  ;;  %v746_v53 = vmul.f32 %v971_v29, %v1670_v58  ;;  %980 = vrsqrt.f32 %v623_v28  ;;  %v561_v0 = vmul.f32 0.0078125, %v443_v18  ;;  %v1099_v58 = vld [vmem:[#allocation2 + $0x58] sm:$0xff] }
 0x15f   :  { %v562_v56 = vmul.f32 0.0078125, %v445_v19  ;;  %v815_v59 = vmul.f32 %v1527_v26, %v745_v43  ;;  %982 = vrsqrt.f32 %v624_v42 }
 0x160   :  { %v973_v44 = vpop.eup %972  ;;  %v816_v30 = vmul.f32 %v1527_v26, %v746_v53  ;;  %v625_v45 = vadd.f32 1e-05, %v561_v0 }
 0x161   :  { %v626_v31 = vadd.f32 1e-05, %v562_v56  ;;  %v975_v1 = vpop.eup %974  ;;  %879 = vst [vmem:[#allocation7 + $0x8] sm:$0xff] %v815_v59  ;;  %v747_v55 = vmul.f32 %v973_v44, %v1279_v3  ;;  %v447_v2 = vpop.xlane.xlu1 %446  ;;  %v1100_v59 = vld [vmem:[#allocation2 + $0x60] sm:$0xff] }
 0x162   :  { %v449_v20 = vpop.xlane.xlu0 %448  ;;  %880 = vst [vmem:[#allocation7 + $0x10] sm:$0xff] %v816_v30  ;;  %v748_v21 = vmul.f32 %v975_v1, %v1285_v5  ;;  %984 = vrsqrt.f32 %v625_v45  ;;  %v563_v12 = vmul.f32 0.0078125, %v447_v2 }
 0x163   :  { %v564_v13 = vmul.f32 0.0078125, %v449_v20  ;;  %v817_v46 = vmul.f32 %v1527_v26, %v747_v55  ;;  %986 = vrsqrt.f32 %v626_v31 }
 0x164   :  { %v977_v32 = vpop.eup %976  ;;  %v818_v33 = vmul.f32 %v1527_v26, %v748_v21  ;;  %v627_v6 = vadd.f32 1e-05, %v563_v12  ;;  %v1101_v12 = vld [vmem:[#allocation2 + $0x68] sm:$0xff] }
 0x165   :  { %v628_v60 = vadd.f32 1e-05, %v564_v13  ;;  %v979_v61 = vpop.eup %978  ;;  %881 = vst [vmem:[#allocation7 + $0x18] sm:$0xff] %v817_v46  ;;  %v749_v3 = vmul.f32 %v1094_v54, %v977_v32  ;;  %v451_v34 = vpop.xlane.xlu1 %450 }
 0x166   :  { %v453_v22 = vpop.xlane.xlu0 %452  ;;  %882 = vst [vmem:[#allocation7 + $0x20] sm:$0xff] %v818_v33  ;;  %v750_v5 = vmul.f32 %v979_v61, %v1291_v7  ;;  %988 = vrsqrt.f32 %v627_v6  ;;  %v565_v35 = vmul.f32 0.0078125, %v451_v34  ;;  %v1102_v33 = vld [vmem:[#allocation2 + $0x70] sm:$0xff] }
 0x167   :  { %v566_v23 = vmul.f32 0.0078125, %v453_v22  ;;  %v819_v52 = vmul.f32 %v1527_v26, %v749_v3  ;;  %990 = vrsqrt.f32 %v628_v60 }
 0x168   :  { %v981_v51 = vpop.eup %980  ;;  %v820_v14 = vmul.f32 %v1527_v26, %v750_v5  ;;  %v629_v15 = vadd.f32 1e-05, %v565_v35 }
 0x169   :  { %v630_v49 = vadd.f32 1e-05, %v566_v23  ;;  %v983_v36 = vpop.eup %982  ;;  %883 = vst [vmem:[#allocation7 + $0x28] sm:$0xff] %v819_v52  ;;  %v751_v37 = vmul.f32 %v1095_v48, %v981_v51  ;;  %v455_v24 = vpop.xlane.xlu1 %454  ;;  %v1103_v23 = vld [vmem:[#allocation2 + $0x78] sm:$0xff] }
 0x16a   :  { %v457_v25 = vpop.xlane.xlu0 %456  ;;  %884 = vst [vmem:[#allocation7 + $0x30] sm:$0xff] %v820_v14  ;;  %v752_v7 = vmul.f32 %v1096_v8, %v983_v36  ;;  %992 = vrsqrt.f32 %v629_v15  ;;  %v567_v9 = vmul.f32 0.0078125, %v455_v24  ;;  %v1104_v15 = vld [vmem:[#allocation2 + $0x80] sm:$0xff] }
 0x16b   :  { %v568_v50 = vmul.f32 0.0078125, %v457_v25  ;;  %v821_v38 = vmul.f32 %v1527_v26, %v751_v37  ;;  %994 = vrsqrt.f32 %v630_v49 }
 0x16c   :  { %v985_v47 = vpop.eup %984  ;;  %v822_v39 = vmul.f32 %v1527_v26, %v752_v7  ;;  %v631_v16 = vadd.f32 1e-05, %v567_v9 }
 0x16d   :  { %v632_v17 = vadd.f32 1e-05, %v568_v50  ;;  %v987_v27 = vpop.eup %986  ;;  %885 = vst [vmem:[#allocation7 + $0x38] sm:$0xff] %v821_v38  ;;  %v753_v40 = vmul.f32 %v1097_v62, %v985_v47  ;;  %v459_v63 = vpop.xlane.xlu1 %458  ;;  %v1105_v50 = vld [vmem:[#allocation2 + $0x88] sm:$0xff] }
 0x16e   :  { %v461_v41 = vpop.xlane.xlu0 %460  ;;  %886 = vst [vmem:[#allocation7 + $0x40] sm:$0xff] %v822_v39  ;;  %v754_v57 = vmul.f32 %v1098_v4, %v987_v27  ;;  %996 = vrsqrt.f32 %v631_v16  ;;  %v569_v10 = vmul.f32 0.0078125, %v459_v63  ;;  %v1106_v16 = vld [vmem:[#allocation2 + $0x90] sm:$0xff] }
 0x16f   :  { %v570_v11 = vmul.f32 0.0078125, %v461_v41  ;;  %v823_v28 = vmul.f32 %v1527_v26, %v753_v40  ;;  %998 = vrsqrt.f32 %v632_v17 }
 0x170   :  { %v989_v42 = vpop.eup %988  ;;  %v824_v29 = vmul.f32 %v1527_v26, %v754_v57  ;;  %v633_v43 = vadd.f32 1e-05, %v569_v10 }
 0x171   :  { %v634_v18 = vadd.f32 1e-05, %v570_v11  ;;  %v991_v19 = vpop.eup %990  ;;  %887 = vst [vmem:[#allocation7 + $0x48] sm:$0xff] %v823_v28  ;;  %v755_v53 = vmul.f32 %v1099_v58, %v989_v42  ;;  %v463_v0 = vpop.xlane.xlu1 %462  ;;  %v1107_v11 = vld [vmem:[#allocation2 + $0x98] sm:$0xff] }
 0x172   :  { %v465_v56 = vpop.xlane.xlu0 %464  ;;  %888 = vst [vmem:[#allocation7 + $0x50] sm:$0xff] %v824_v29  ;;  %v756_v44 = vmul.f32 %v1100_v59, %v991_v19  ;;  %1000 = vrsqrt.f32 %v633_v43  ;;  %v571_v30 = vmul.f32 0.0078125, %v463_v0  ;;  %v1108_v43 = vld [vmem:[#allocation2 + $0xa0] sm:$0xff] }
 0x173   :  { %v572_v45 = vmul.f32 0.0078125, %v465_v56  ;;  %v825_v31 = vmul.f32 %v1527_v26, %v755_v53  ;;  %1002 = vrsqrt.f32 %v634_v18 }
 0x174   :  { %v993_v1 = vpop.eup %992  ;;  %v826_v55 = vmul.f32 %v1527_v26, %v756_v44  ;;  %v635_v2 = vadd.f32 1e-05, %v571_v30 }
 0x175   :  { %v636_v20 = vadd.f32 1e-05, %v572_v45  ;;  %v995_v21 = vpop.eup %994  ;;  %889 = vst [vmem:[#allocation7 + $0x58] sm:$0xff] %v825_v31  ;;  %v757_v13 = vmul.f32 %v1101_v12, %v993_v1  ;;  %v467_v46 = vpop.xlane.xlu1 %466  ;;  %v1109_v45 = vld [vmem:[#allocation2 + $0xa8] sm:$0xff] }
 0x176   :  { %v469_v32 = vpop.xlane.xlu0 %468  ;;  %890 = vst [vmem:[#allocation7 + $0x60] sm:$0xff] %v826_v55  ;;  %v758_v6 = vmul.f32 %v1102_v33, %v995_v21  ;;  %1004 = vrsqrt.f32 %v635_v2  ;;  %v573_v60 = vmul.f32 0.0078125, %v467_v46  ;;  %v1110_v2 = vld [vmem:[#allocation2 + $0xb0] sm:$0xff] }
 0x177   :  { %v574_v61 = vmul.f32 0.0078125, %v469_v32  ;;  %v827_v54 = vmul.f32 %v1527_v26, %v757_v13  ;;  %1006 = vrsqrt.f32 %v636_v20 }
 0x178   :  { %v997_v3 = vpop.eup %996  ;;  %v828_v34 = vmul.f32 %v1527_v26, %v758_v6  ;;  %v637_v22 = vadd.f32 1e-05, %v573_v60 }
 0x179   :  { %v638_v5 = vadd.f32 1e-05, %v574_v61  ;;  %v999_v35 = vpop.eup %998  ;;  %891 = vst [vmem:[#allocation7 + $0x68] sm:$0xff] %v827_v54  ;;  %v759_v52 = vmul.f32 %v1103_v23, %v997_v3  ;;  %v471_v51 = vpop.xlane.xlu1 %470  ;;  %v1111_v61 = vld [vmem:[#allocation2 + $0xb8] sm:$0xff] }
 0x17a   :  { %v473_v14 = vpop.xlane.xlu0 %472  ;;  %892 = vst [vmem:[#allocation7 + $0x70] sm:$0xff] %v828_v34  ;;  %v760_v49 = vmul.f32 %v1104_v15, %v999_v35  ;;  %1008 = vrsqrt.f32 %v637_v22  ;;  %v575_v36 = vmul.f32 0.0078125, %v471_v51  ;;  %v1112_v22 = vld [vmem:[#allocation2 + $0xc0] sm:$0xff] }
 0x17b   :  { %v576_v48 = vmul.f32 0.0078125, %v473_v14  ;;  %v829_v37 = vmul.f32 %v1527_v26, %v759_v52  ;;  %1010 = vrsqrt.f32 %v638_v5 }
 0x17c   :  { %v1001_v24 = vpop.eup %1000  ;;  %v830_v25 = vmul.f32 %v1527_v26, %v760_v49  ;;  %v639_v8 = vadd.f32 1e-05, %v575_v36 }
 0x17d   :  { %v640_v7 = vadd.f32 1e-05, %v576_v48  ;;  %v1003_v9 = vpop.eup %1002  ;;  %893 = vst [vmem:[#allocation7 + $0x78] sm:$0xff] %v829_v37  ;;  %v761_v38 = vmul.f32 %v1105_v50, %v1001_v24  ;;  %v475_v47 = vpop.xlane.xlu1 %474  ;;  %v1113_v48 = vld [vmem:[#allocation2 + $0xc8] sm:$0xff] }
 0x17e   :  { %v477_v39 = vpop.xlane.xlu0 %476  ;;  %894 = vst [vmem:[#allocation7 + $0x80] sm:$0xff] %v830_v25  ;;  %v762_v17 = vmul.f32 %v1106_v16, %v1003_v9  ;;  %1012 = vrsqrt.f32 %v639_v8  ;;  %v577_v27 = vmul.f32 0.0078125, %v475_v47  ;;  %v1114_v8 = vld [vmem:[#allocation2 + $0xd0] sm:$0xff] }
 0x17f   :  { %v578_v62 = vmul.f32 0.0078125, %v477_v39  ;;  %v831_v40 = vmul.f32 %v1527_v26, %v761_v38  ;;  %1014 = vrsqrt.f32 %v640_v7 }
 0x180   :  { %v1005_v63 = vpop.eup %1004  ;;  %v832_v41 = vmul.f32 %v1527_v26, %v762_v17  ;;  %v641_v4 = vadd.f32 1e-05, %v577_v27 }
 0x181   :  { %v642_v57 = vadd.f32 1e-05, %v578_v62  ;;  %v1007_v10 = vpop.eup %1006  ;;  %895 = vst [vmem:[#allocation7 + $0x88] sm:$0xff] %v831_v40  ;;  %v763_v28 = vmul.f32 %v1107_v11, %v1005_v63  ;;  %v479_v42 = vpop.xlane.xlu1 %478  ;;  %v1115_v62 = vld [vmem:[#allocation2 + $0xd8] sm:$0xff] }
 0x182   :  { %v481_v29 = vpop.xlane.xlu0 %480  ;;  %896 = vst [vmem:[#allocation7 + $0x90] sm:$0xff] %v832_v41  ;;  %v764_v18 = vmul.f32 %v1108_v43, %v1007_v10  ;;  %1016 = vrsqrt.f32 %v641_v4  ;;  %v579_v19 = vmul.f32 0.0078125, %v479_v42  ;;  %v1116_v4 = vld [vmem:[#allocation2 + $0xe0] sm:$0xff] }
 0x183   :  { %v580_v58 = vmul.f32 0.0078125, %v481_v29  ;;  %v833_v53 = vmul.f32 %v1527_v26, %v763_v28  ;;  %1018 = vrsqrt.f32 %v642_v57 }
 0x184   :  { %v1009_v0 = vpop.eup %1008  ;;  %v834_v56 = vmul.f32 %v1527_v26, %v764_v18  ;;  %v643_v59 = vadd.f32 1e-05, %v579_v19 }
 0x185   :  { %v644_v44 = vadd.f32 1e-05, %v580_v58  ;;  %v1011_v30 = vpop.eup %1010  ;;  %897 = vst [vmem:[#allocation7 + $0x98] sm:$0xff] %v833_v53  ;;  %v765_v31 = vmul.f32 %v1109_v45, %v1009_v0  ;;  %v483_v1 = vpop.xlane.xlu1 %482  ;;  %v1117_v58 = vld [vmem:[#allocation2 + $0xe8] sm:$0xff] }
 0x186   :  { %v485_v55 = vpop.xlane.xlu0 %484  ;;  %898 = vst [vmem:[#allocation7 + $0xa0] sm:$0xff] %v834_v56  ;;  %v766_v20 = vmul.f32 %v1110_v2, %v1011_v30  ;;  %1020 = vrsqrt.f32 %v643_v59  ;;  %v581_v21 = vmul.f32 0.0078125, %v483_v1  ;;  %v1118_v59 = vld [vmem:[#allocation2 + $0xf0] sm:$0xff] }
 0x187   :  { %v582_v12 = vmul.f32 0.0078125, %v485_v55  ;;  %v835_v13 = vmul.f32 %v1527_v26, %v765_v31  ;;  %1022 = vrsqrt.f32 %v644_v44 }
 0x188   :  { %v1013_v46 = vpop.eup %1012  ;;  %v836_v32 = vmul.f32 %v1527_v26, %v766_v20  ;;  %v645_v33 = vadd.f32 1e-05, %v581_v21 }
 0x189   :  { %v646_v6 = vadd.f32 1e-05, %v582_v12  ;;  %v1015_v60 = vpop.eup %1014  ;;  %899 = vst [vmem:[#allocation7 + $0xa8] sm:$0xff] %v835_v13  ;;  %v767_v54 = vmul.f32 %v1111_v61, %v1013_v46  ;;  %v487_v3 = vpop.xlane.xlu1 %486  ;;  %v1119_v12 = vld [vmem:[#allocation2 + $0xf8] sm:$0xff] }
 0x18a   :  { %v489_v34 = vpop.xlane.xlu0 %488  ;;  %900 = vst [vmem:[#allocation7 + $0xb0] sm:$0xff] %v836_v32  ;;  %v768_v5 = vmul.f32 %v1112_v22, %v1015_v60  ;;  %1024 = vrsqrt.f32 %v645_v33  ;;  %v583_v35 = vmul.f32 0.0078125, %v487_v3  ;;  %v1120_v33 = vld [vmem:[#allocation2 + $0x100] sm:$0xff] }
 0x18b   :  { %v584_v23 = vmul.f32 0.0078125, %v489_v34  ;;  %v837_v52 = vmul.f32 %v1527_v26, %v767_v54  ;;  %1026 = vrsqrt.f32 %v646_v6 }
 0x18c   :  { %v1017_v51 = vpop.eup %1016  ;;  %v838_v14 = vmul.f32 %v1527_v26, %v768_v5  ;;  %v647_v15 = vadd.f32 1e-05, %v583_v35 }
 0x18d   :  { %v648_v49 = vadd.f32 1e-05, %v584_v23  ;;  %v1019_v36 = vpop.eup %1018  ;;  %901 = vst [vmem:[#allocation7 + $0xb8] sm:$0xff] %v837_v52  ;;  %v769_v37 = vmul.f32 %v1113_v48, %v1017_v51  ;;  %v491_v24 = vpop.xlane.xlu1 %490  ;;  %v1121_v23 = vld [vmem:[#allocation2 + $0x108] sm:$0xff] }
 0x18e   :  { %v493_v25 = vpop.xlane.xlu0 %492  ;;  %902 = vst [vmem:[#allocation7 + $0xc0] sm:$0xff] %v838_v14  ;;  %v770_v7 = vmul.f32 %v1114_v8, %v1019_v36  ;;  %1028 = vrsqrt.f32 %v647_v15  ;;  %v585_v9 = vmul.f32 0.0078125, %v491_v24  ;;  %v1122_v15 = vld [vmem:[#allocation2 + $0x110] sm:$0xff] }
 0x18f   :  { %v586_v50 = vmul.f32 0.0078125, %v493_v25  ;;  %v839_v38 = vmul.f32 %v1527_v26, %v769_v37  ;;  %1030 = vrsqrt.f32 %v648_v49 }
 0x190   :  { %v1021_v47 = vpop.eup %1020  ;;  %v840_v39 = vmul.f32 %v1527_v26, %v770_v7  ;;  %v649_v16 = vadd.f32 1e-05, %v585_v9 }
 0x191   :  { %v650_v17 = vadd.f32 1e-05, %v586_v50  ;;  %v1023_v27 = vpop.eup %1022  ;;  %903 = vst [vmem:[#allocation7 + $0xc8] sm:$0xff] %v839_v38  ;;  %v771_v40 = vmul.f32 %v1115_v62, %v1021_v47  ;;  %v495_v63 = vpop.xlane.xlu1 %494  ;;  %v1123_v50 = vld [vmem:[#allocation2 + $0x118] sm:$0xff] }
 0x192   :  { %v497_v41 = vpop.xlane.xlu0 %496  ;;  %904 = vst [vmem:[#allocation7 + $0xd0] sm:$0xff] %v840_v39  ;;  %v772_v57 = vmul.f32 %v1116_v4, %v1023_v27  ;;  %1032 = vrsqrt.f32 %v649_v16  ;;  %v587_v10 = vmul.f32 0.0078125, %v495_v63  ;;  %v1124_v16 = vld [vmem:[#allocation2 + $0x120] sm:$0xff] }
 0x193   :  { %v588_v11 = vmul.f32 0.0078125, %v497_v41  ;;  %v841_v28 = vmul.f32 %v1527_v26, %v771_v40  ;;  %1034 = vrsqrt.f32 %v650_v17 }
 0x194   :  { %v1025_v42 = vpop.eup %1024  ;;  %v842_v29 = vmul.f32 %v1527_v26, %v772_v57  ;;  %v651_v43 = vadd.f32 1e-05, %v587_v10 }
 0x195   :  { %v652_v18 = vadd.f32 1e-05, %v588_v11  ;;  %v1027_v19 = vpop.eup %1026  ;;  %905 = vst [vmem:[#allocation7 + $0xd8] sm:$0xff] %v841_v28  ;;  %v773_v53 = vmul.f32 %v1117_v58, %v1025_v42  ;;  %v499_v0 = vpop.xlane.xlu1 %498  ;;  %v1125_v11 = vld [vmem:[#allocation2 + $0x128] sm:$0xff] }
 0x196   :  { %v501_v56 = vpop.xlane.xlu0 %500  ;;  %906 = vst [vmem:[#allocation7 + $0xe0] sm:$0xff] %v842_v29  ;;  %v774_v44 = vmul.f32 %v1118_v59, %v1027_v19  ;;  %1036 = vrsqrt.f32 %v651_v43  ;;  %v589_v30 = vmul.f32 0.0078125, %v499_v0  ;;  %v1126_v43 = vld [vmem:[#allocation2 + $0x130] sm:$0xff] }
 0x197   :  { %v590_v45 = vmul.f32 0.0078125, %v501_v56  ;;  %v843_v31 = vmul.f32 %v1527_v26, %v773_v53  ;;  %1038 = vrsqrt.f32 %v652_v18 }
 0x198   :  { %v1029_v1 = vpop.eup %1028  ;;  %v844_v55 = vmul.f32 %v1527_v26, %v774_v44  ;;  %v653_v2 = vadd.f32 1e-05, %v589_v30 }
 0x199   :  { %v654_v20 = vadd.f32 1e-05, %v590_v45  ;;  %v1031_v21 = vpop.eup %1030  ;;  %907 = vst [vmem:[#allocation7 + $0xe8] sm:$0xff] %v843_v31  ;;  %v775_v13 = vmul.f32 %v1119_v12, %v1029_v1  ;;  %v503_v46 = vpop.xlane.xlu1 %502  ;;  %v1127_v45 = vld [vmem:[#allocation2 + $0x138] sm:$0xff] }
 0x19a   :  { %v505_v32 = vpop.xlane.xlu0 %504  ;;  %908 = vst [vmem:[#allocation7 + $0xf0] sm:$0xff] %v844_v55  ;;  %v776_v6 = vmul.f32 %v1120_v33, %v1031_v21  ;;  %1040 = vrsqrt.f32 %v653_v2  ;;  %v591_v60 = vmul.f32 0.0078125, %v503_v46  ;;  %v1128_v2 = vld [vmem:[#allocation2 + $0x140] sm:$0xff] }
 0x19b   :  { %v592_v61 = vmul.f32 0.0078125, %v505_v32  ;;  %v845_v54 = vmul.f32 %v1527_v26, %v775_v13  ;;  %1042 = vrsqrt.f32 %v654_v20 }
 0x19c   :  { %v1033_v3 = vpop.eup %1032  ;;  %v846_v34 = vmul.f32 %v1527_v26, %v776_v6  ;;  %v655_v22 = vadd.f32 1e-05, %v591_v60 }
 0x19d   :  { %v656_v5 = vadd.f32 1e-05, %v592_v61  ;;  %v1035_v35 = vpop.eup %1034  ;;  %909 = vst [vmem:[#allocation7 + $0xf8] sm:$0xff] %v845_v54  ;;  %v777_v52 = vmul.f32 %v1121_v23, %v1033_v3  ;;  %v507_v51 = vpop.xlane.xlu1 %506  ;;  %v1129_v61 = vld [vmem:[#allocation2 + $0x148] sm:$0xff] }
 0x19e   :  { %v509_v14 = vpop.xlane.xlu0 %508  ;;  %910 = vst [vmem:[#allocation7 + $0x100] sm:$0xff] %v846_v34  ;;  %v778_v49 = vmul.f32 %v1122_v15, %v1035_v35  ;;  %1044 = vrsqrt.f32 %v655_v22  ;;  %v593_v36 = vmul.f32 0.0078125, %v507_v51  ;;  %v1130_v22 = vld [vmem:[#allocation2 + $0x150] sm:$0xff] }
 0x19f   :  { %v594_v48 = vmul.f32 0.0078125, %v509_v14  ;;  %v847_v37 = vmul.f32 %v1527_v26, %v777_v52  ;;  %1046 = vrsqrt.f32 %v656_v5 }
 0x1a0   :  { %v1037_v24 = vpop.eup %1036  ;;  %v848_v25 = vmul.f32 %v1527_v26, %v778_v49  ;;  %v657_v8 = vadd.f32 1e-05, %v593_v36 }
 0x1a1   :  { %v658_v7 = vadd.f32 1e-05, %v594_v48  ;;  %v1039_v9 = vpop.eup %1038  ;;  %911 = vst [vmem:[#allocation7 + $0x108] sm:$0xff] %v847_v37  ;;  %v779_v38 = vmul.f32 %v1123_v50, %v1037_v24  ;;  %v511_v47 = vpop.xlane.xlu1 %510  ;;  %v1131_v48 = vld [vmem:[#allocation2 + $0x158] sm:$0xff] }
 0x1a2   :  { %v513_v39 = vpop.xlane.xlu0 %512  ;;  %912 = vst [vmem:[#allocation7 + $0x110] sm:$0xff] %v848_v25  ;;  %v780_v17 = vmul.f32 %v1124_v16, %v1039_v9  ;;  %1048 = vrsqrt.f32 %v657_v8  ;;  %v595_v27 = vmul.f32 0.0078125, %v511_v47  ;;  %v1132_v8 = vld [vmem:[#allocation2 + $0x160] sm:$0xff] }
 0x1a3   :  { %v596_v62 = vmul.f32 0.0078125, %v513_v39  ;;  %v849_v40 = vmul.f32 %v1527_v26, %v779_v38  ;;  %1050 = vrsqrt.f32 %v658_v7 }
 0x1a4   :  { %v1041_v63 = vpop.eup %1040  ;;  %v850_v41 = vmul.f32 %v1527_v26, %v780_v17  ;;  %v659_v4 = vadd.f32 1e-05, %v595_v27 }
 0x1a5   :  { %v660_v57 = vadd.f32 1e-05, %v596_v62  ;;  %v1043_v10 = vpop.eup %1042  ;;  %913 = vst [vmem:[#allocation7 + $0x118] sm:$0xff] %v849_v40  ;;  %v781_v28 = vmul.f32 %v1125_v11, %v1041_v63  ;;  %v515_v42 = vpop.xlane.xlu1 %514  ;;  %v1133_v62 = vld [vmem:[#allocation2 + $0x168] sm:$0xff] }
 0x1a6   :  { %v517_v29 = vpop.xlane.xlu0 %516  ;;  %914 = vst [vmem:[#allocation7 + $0x120] sm:$0xff] %v850_v41  ;;  %v782_v18 = vmul.f32 %v1126_v43, %v1043_v10  ;;  %1052 = vrsqrt.f32 %v659_v4  ;;  %v597_v19 = vmul.f32 0.0078125, %v515_v42  ;;  %v1134_v4 = vld [vmem:[#allocation2 + $0x170] sm:$0xff] }
 0x1a7   :  { %v598_v58 = vmul.f32 0.0078125, %v517_v29  ;;  %v851_v53 = vmul.f32 %v1527_v26, %v781_v28  ;;  %1054 = vrsqrt.f32 %v660_v57 }
 0x1a8   :  { %v1045_v0 = vpop.eup %1044  ;;  %v852_v56 = vmul.f32 %v1527_v26, %v782_v18  ;;  %v661_v59 = vadd.f32 1e-05, %v597_v19 }
 0x1a9   :  { %v662_v44 = vadd.f32 1e-05, %v598_v58  ;;  %v1047_v30 = vpop.eup %1046  ;;  %915 = vst [vmem:[#allocation7 + $0x128] sm:$0xff] %v851_v53  ;;  %v783_v31 = vmul.f32 %v1127_v45, %v1045_v0  ;;  %v519_v1 = vpop.xlane.xlu1 %518  ;;  %v1135_v58 = vld [vmem:[#allocation2 + $0x178] sm:$0xff] }
 0x1aa   :  { %v521_v55 = vpop.xlane.xlu0 %520  ;;  %916 = vst [vmem:[#allocation7 + $0x130] sm:$0xff] %v852_v56  ;;  %v784_v20 = vmul.f32 %v1128_v2, %v1047_v30  ;;  %1056 = vrsqrt.f32 %v661_v59  ;;  %v599_v21 = vmul.f32 0.0078125, %v519_v1  ;;  %v1136_v59 = vld [vmem:[#allocation2 + $0x180] sm:$0xff] }
 0x1ab   :  { %v600_v12 = vmul.f32 0.0078125, %v521_v55  ;;  %v853_v13 = vmul.f32 %v1527_v26, %v783_v31  ;;  %1058 = vrsqrt.f32 %v662_v44 }
 0x1ac   :  { %v1049_v46 = vpop.eup %1048  ;;  %v854_v32 = vmul.f32 %v1527_v26, %v784_v20  ;;  %v663_v33 = vadd.f32 1e-05, %v599_v21 }
 0x1ad   :  { %v664_v6 = vadd.f32 1e-05, %v600_v12  ;;  %v1051_v60 = vpop.eup %1050  ;;  %917 = vst [vmem:[#allocation7 + $0x138] sm:$0xff] %v853_v13  ;;  %v785_v54 = vmul.f32 %v1129_v61, %v1049_v46  ;;  %v523_v3 = vpop.xlane.xlu1 %522  ;;  %v1137_v12 = vld [vmem:[#allocation2 + $0x188] sm:$0xff] }
 0x1ae   :  { %v525_v34 = vpop.xlane.xlu0 %524  ;;  %918 = vst [vmem:[#allocation7 + $0x140] sm:$0xff] %v854_v32  ;;  %v786_v5 = vmul.f32 %v1130_v22, %v1051_v60  ;;  %1060 = vrsqrt.f32 %v663_v33  ;;  %v601_v35 = vmul.f32 0.0078125, %v523_v3  ;;  %v1138_v33 = vld [vmem:[#allocation2 + $0x190] sm:$0xff] }
 0x1af   :  { %v602_v23 = vmul.f32 0.0078125, %v525_v34  ;;  %v855_v52 = vmul.f32 %v1527_v26, %v785_v54  ;;  %1062 = vrsqrt.f32 %v664_v6 }
 0x1b0   :  { %v1053_v51 = vpop.eup %1052  ;;  %v856_v14 = vmul.f32 %v1527_v26, %v786_v5  ;;  %v665_v15 = vadd.f32 1e-05, %v601_v35 }
 0x1b1   :  { %v666_v49 = vadd.f32 1e-05, %v602_v23  ;;  %v1055_v36 = vpop.eup %1054  ;;  %919 = vst [vmem:[#allocation7 + $0x148] sm:$0xff] %v855_v52  ;;  %v787_v37 = vmul.f32 %v1131_v48, %v1053_v51  ;;  %v527_v24 = vpop.xlane.xlu1 %526  ;;  %v1139_v23 = vld [vmem:[#allocation2 + $0x198] sm:$0xff] }
 0x1b2   :  { %v529_v25 = vpop.xlane.xlu0 %528  ;;  %920 = vst [vmem:[#allocation7 + $0x150] sm:$0xff] %v856_v14  ;;  %v788_v7 = vmul.f32 %v1132_v8, %v1055_v36  ;;  %1064 = vrsqrt.f32 %v665_v15  ;;  %v603_v9 = vmul.f32 0.0078125, %v527_v24  ;;  %v1140_v15 = vld [vmem:[#allocation2 + $0x1a0] sm:$0xff] }
 0x1b3   :  { %v604_v50 = vmul.f32 0.0078125, %v529_v25  ;;  %v857_v38 = vmul.f32 %v1527_v26, %v787_v37  ;;  %1066 = vrsqrt.f32 %v666_v49 }
 0x1b4   :  { %v1057_v47 = vpop.eup %1056  ;;  %v858_v39 = vmul.f32 %v1527_v26, %v788_v7  ;;  %v667_v16 = vadd.f32 1e-05, %v603_v9 }
 0x1b5   :  { %v668_v17 = vadd.f32 1e-05, %v604_v50  ;;  %v1059_v27 = vpop.eup %1058  ;;  %921 = vst [vmem:[#allocation7 + $0x158] sm:$0xff] %v857_v38  ;;  %v789_v40 = vmul.f32 %v1133_v62, %v1057_v47  ;;  %v531_v63 = vpop.xlane.xlu1 %530  ;;  %v1141_v50 = vld [vmem:[#allocation2 + $0x1a8] sm:$0xff] }
 0x1b6   :  { %v533_v41 = vpop.xlane.xlu0 %532  ;;  %922 = vst [vmem:[#allocation7 + $0x160] sm:$0xff] %v858_v39  ;;  %v790_v57 = vmul.f32 %v1134_v4, %v1059_v27  ;;  %1068 = vrsqrt.f32 %v667_v16  ;;  %v605_v10 = vmul.f32 0.0078125, %v531_v63  ;;  %v1142_v16 = vld [vmem:[#allocation2 + $0x1b0] sm:$0xff] }
 0x1b7   :  { %v606_v11 = vmul.f32 0.0078125, %v533_v41  ;;  %v859_v28 = vmul.f32 %v1527_v26, %v789_v40  ;;  %1070 = vrsqrt.f32 %v668_v17 }
 0x1b8   :  { %v1061_v42 = vpop.eup %1060  ;;  %v860_v29 = vmul.f32 %v1527_v26, %v790_v57  ;;  %v669_v43 = vadd.f32 1e-05, %v605_v10 }
 0x1b9   :  { %v670_v18 = vadd.f32 1e-05, %v606_v11  ;;  %v1063_v19 = vpop.eup %1062  ;;  %923 = vst [vmem:[#allocation7 + $0x168] sm:$0xff] %v859_v28  ;;  %v791_v53 = vmul.f32 %v1135_v58, %v1061_v42  ;;  %v535_v0 = vpop.xlane.xlu1 %534  ;;  %v1143_v11 = vld [vmem:[#allocation2 + $0x1b8] sm:$0xff] }
 0x1ba   :  { %v537_v56 = vpop.xlane.xlu0 %536  ;;  %924 = vst [vmem:[#allocation7 + $0x170] sm:$0xff] %v860_v29  ;;  %v792_v44 = vmul.f32 %v1136_v59, %v1063_v19  ;;  %1072 = vrsqrt.f32 %v669_v43  ;;  %v607_v30 = vmul.f32 0.0078125, %v535_v0  ;;  %v1144_v29 = vld [vmem:[#allocation2 + $0x1c0] sm:$0xff]  ;;  %v1145_v59 = vld [vmem:[#allocation2 + $0x1c8] sm:$0xff] }
 0x1bb   :  { %v608_v45 = vmul.f32 0.0078125, %v537_v56  ;;  %v861_v31 = vmul.f32 %v1527_v26, %v791_v53  ;;  %1074 = vrsqrt.f32 %v670_v18 }
 0x1bc   :  { %v1065_v1 = vpop.eup %1064  ;;  %v862_v55 = vmul.f32 %v1527_v26, %v792_v44  ;;  %v671_v2 = vadd.f32 1e-05, %v607_v30  ;;  %v1146_v30 = vld [vmem:[#allocation2 + $0x1d0] sm:$0xff] }
 0x1bd   :  { %v672_v20 = vadd.f32 1e-05, %v608_v45  ;;  %v1067_v21 = vpop.eup %1066  ;;  %925 = vst [vmem:[#allocation7 + $0x178] sm:$0xff] %v861_v31  ;;  %v793_v13 = vmul.f32 %v1137_v12, %v1065_v1  ;;  %v539_v46 = vpop.xlane.xlu1 %538  ;;  %v1148_v12 = vld [vmem:[#allocation2 + $0x1e0] sm:$0xff] }
 0x1be   :  { %v541_v32 = vpop.xlane.xlu0 %540  ;;  %926 = vst [vmem:[#allocation7 + $0x180] sm:$0xff] %v862_v55  ;;  %v794_v6 = vmul.f32 %v1138_v33, %v1067_v21  ;;  %1076 = vrsqrt.f32 %v671_v2  ;;  %v609_v60 = vmul.f32 0.0078125, %v539_v46 }
 0x1bf   :  { %v610_v61 = vmul.f32 0.0078125, %v541_v32  ;;  %v863_v54 = vmul.f32 %v1527_v26, %v793_v13  ;;  %1078 = vrsqrt.f32 %v672_v20  ;;  %v1147_v20 = vld [vmem:[#allocation2 + $0x1d8] sm:$0xff] }
 0x1c0   :  { %v1069_v3 = vpop.eup %1068  ;;  %v864_v34 = vmul.f32 %v1527_v26, %v794_v6  ;;  %v673_v22 = vadd.f32 1e-05, %v609_v60  ;;  %v1149_v60 = vld [vmem:[#allocation2 + $0x1e8] sm:$0xff] }
 0x1c1   :  { %v674_v5 = vadd.f32 1e-05, %v610_v61  ;;  %v1071_v35 = vpop.eup %1070  ;;  %927 = vst [vmem:[#allocation7 + $0x188] sm:$0xff] %v863_v54  ;;  %v795_v52 = vmul.f32 %v1139_v23, %v1069_v3  ;;  %v543_v51 = vpop.xlane.xlu1 %542  ;;  %v1150_v54 = vld [vmem:[#allocation2 + $0x1f0] sm:$0xff] }
 0x1c2   :  { %v545_v14 = vpop.xlane.xlu0 %544  ;;  %928 = vst [vmem:[#allocation7 + $0x190] sm:$0xff] %v864_v34  ;;  %v796_v49 = vmul.f32 %v1140_v15, %v1071_v35  ;;  %1080 = vrsqrt.f32 %v673_v22  ;;  %v611_v36 = vmul.f32 0.0078125, %v543_v51  ;;  %v1151_v35 = vld [vmem:[#allocation2 + $0x1f8] sm:$0xff] }
 0x1c3   :  { %v612_v48 = vmul.f32 0.0078125, %v545_v14  ;;  %v865_v37 = vmul.f32 %v1527_v26, %v795_v52  ;;  %1082 = vrsqrt.f32 %v674_v5 }
 0x1c4   :  { %v1073_v24 = vpop.eup %1072  ;;  %v866_v25 = vmul.f32 %v1527_v26, %v796_v49  ;;  %v675_v8 = vadd.f32 1e-05, %v611_v36 }
 0x1c5   :  { %v676_v7 = vadd.f32 1e-05, %v612_v48  ;;  %v1075_v9 = vpop.eup %1074  ;;  %929 = vst [vmem:[#allocation7 + $0x198] sm:$0xff] %v865_v37  ;;  %v797_v38 = vmul.f32 %v1141_v50, %v1073_v24  ;;  %v547_v47 = vpop.xlane.xlu1 %546 }
 0x1c6   :  { %v549_v39 = vpop.xlane.xlu0 %548  ;;  %930 = vst [vmem:[#allocation7 + $0x1a0] sm:$0xff] %v866_v25  ;;  %v798_v17 = vmul.f32 %v1142_v16, %v1075_v9  ;;  %1084 = vrsqrt.f32 %v675_v8  ;;  %v613_v27 = vmul.f32 0.0078125, %v547_v47 }
 0x1c7   :  { %v614_v62 = vmul.f32 0.0078125, %v549_v39  ;;  %v867_v40 = vmul.f32 %v1527_v26, %v797_v38  ;;  %1086 = vrsqrt.f32 %v676_v7 }
 0x1c8   :  { %v1077_v63 = vpop.eup %1076  ;;  %v868_v41 = vmul.f32 %v1527_v26, %v798_v17  ;;  %v677_v4 = vadd.f32 1e-05, %v613_v27 }
 0x1c9   :  { %v678_v57 = vadd.f32 1e-05, %v614_v62  ;;  %v1079_v10 = vpop.eup %1078  ;;  %931 = vst [vmem:[#allocation7 + $0x1a8] sm:$0xff] %v867_v40  ;;  %v799_v28 = vmul.f32 %v1143_v11, %v1077_v63  ;;  %v551_v42 = vpop.xlane.xlu1 %550 }
 0x1ca   :  { %932 = vst [vmem:[#allocation7 + $0x1b0] sm:$0xff] %v868_v41  ;;  %v800_v43 = vmul.f32 %v1144_v29, %v1079_v10  ;;  %1088 = vrsqrt.f32 %v677_v4  ;;  %v615_v18 = vmul.f32 0.0078125, %v551_v42 }
 0x1cb   :  { %v869_v19 = vmul.f32 %v1527_v26, %v799_v28  ;;  %1090 = vrsqrt.f32 %v678_v57 }
 0x1cc   :  { %v1081_v58 = vpop.eup %1080  ;;  %v870_v53 = vmul.f32 %v1527_v26, %v800_v43  ;;  %v679_v0 = vadd.f32 1e-05, %v615_v18 }
 0x1cd   :  { %v1083_v56 = vpop.eup %1082  ;;  %933 = vst [vmem:[#allocation7 + $0x1b8] sm:$0xff] %v869_v19  ;;  %v801_v44 = vmul.f32 %v1145_v59, %v1081_v58 }
 0x1ce   :  { %934 = vst [vmem:[#allocation7 + $0x1c0] sm:$0xff] %v870_v53  ;;  %v802_v45 = vmul.f32 %v1146_v30, %v1083_v56  ;;  %1092 = vrsqrt.f32 %v679_v0 }
 0x1cf   :  { %v871_v31 = vmul.f32 %v1527_v26, %v801_v44 }
 0x1d0   :  { %v1085_v1 = vpop.eup %1084  ;;  %v872_v55 = vmul.f32 %v1527_v26, %v802_v45 }
 0x1d1   :  { %v1087_v2 = vpop.eup %1086  ;;  %935 = vst [vmem:[#allocation7 + $0x1c8] sm:$0xff] %v871_v31  ;;  %v803_v21 = vmul.f32 %v1147_v20, %v1085_v1 }
 0x1d2   :  { %936 = vst [vmem:[#allocation7 + $0x1d0] sm:$0xff] %v872_v55  ;;  %v804_v13 = vmul.f32 %v1148_v12, %v1087_v2 }
 0x1d3   :  { %v873_v46 = vmul.f32 %v1527_v26, %v803_v21 }
 0x1d4   :  { %v1089_v32 = vpop.eup %1088  ;;  %v874_v33 = vmul.f32 %v1527_v26, %v804_v13 }
 0x1d5   :  { %v1091_v6 = vpop.eup %1090  ;;  %937 = vst [vmem:[#allocation7 + $0x1d8] sm:$0xff] %v873_v46  ;;  %v805_v61 = vmul.f32 %v1149_v60, %v1089_v32 }
 0x1d6   :  { %938 = vst [vmem:[#allocation7 + $0x1e0] sm:$0xff] %v874_v33  ;;  %v806_v3 = vmul.f32 %v1150_v54, %v1091_v6 }
 0x1d7   :  { %v875_v34 = vmul.f32 %v1527_v26, %v805_v61 }
 0x1d8   :  { %v1093_v22 = vpop.eup %1092  ;;  %v876_v5 = vmul.f32 %v1527_v26, %v806_v3 }
 0x1d9   :  { %939 = vst [vmem:[#allocation7 + $0x1e8] sm:$0xff] %v875_v34  ;;  %v807_v23 = vmul.f32 %v1151_v35, %v1093_v22 }
 0x1da   :  { %940 = vst [vmem:[#allocation7 + $0x1f0] sm:$0xff] %v876_v5 }
 0x1db   :  { %v877_v52 = vmul.f32 %v1527_v26, %v807_v23 }
 0x1dd   :  { %941 = vst [vmem:[#allocation7 + $0x1f8] sm:$0xff] %v877_v52 }
 0x1de   :  { %1207 = shalt.err (!%p1204_p6)
}
 0x1df   :  { %s1208_s11 = scalar_lea.hbm %s1616_s2, 8192 }
 0x1e0   :  { %p1209_p7 = scmp.ne.s32.totalorder %s1616_s2, %s1208_s11  ;;  %p1212_p8 = scmp.lt.u32.totalorder %s1208_s11, %s1616_s2 }
 0x1e2   :  { %p1214_p9 = pnand %p1212_p8, %p1209_p7 }
 0x1e4   :  { %1217 = shalt.err (!%p1214_p9)
}
 0x1e5   :  { %953 = dma.vmem_to_hbm [thread:$0]  %s948_s7, 8192, %s1616_s2, [#allocation4], %s1225_s19, %s1225_s19, %s1226_s20  }
 0x1e6   :  { %1222 = dma.done.wait [#allocation4], 8192  }
 0x1e7   :  { %1223 = vsyncadd [#allocation4], 4294959104 }
 0x1e8   :  { %957 = vsyncpa [#allocation3], 1 }
 0x1e9   :  { %958 = vsyncpa [#allocation6], 1 }
 0x1ea   :  { %959 = vsyncpa [#allocation4], 1 }

</bundles_post_ra>
